<compile_context>
chip_gen: v7x
topology: tpu7x:2x2x1
jax: 0.10.0
libtpu: 0.0.40
codegen_flags: <defaults>
</compile_context>

<pallas_src>
import math
from functools import partial

import jax
import jax.numpy as jnp
from jax.experimental import pallas as pl
from jax.experimental.pallas import tpu as pltpu


# ---------------------------------------------------------------------------
# Generation-aware VMEM budget (v7x: 64 MiB/TC, v5e/v6e: 128 MiB).
# ---------------------------------------------------------------------------
def _vmem_cap_bytes():
    try:
        cap = int(pltpu.get_tpu_info().vmem_capacity_bytes)
    except Exception:
        cap = 64 << 20  # conservative default = v7x capacity
    # leave ~20% headroom for compiler-internal scratch / pipeline buffers
    return int(cap * 0.8)


# ---------------------------------------------------------------------------
# Kernel 1: noisy top-k router. One grid step per batch element; the per-batch
# router weights are selected by the scalar-prefetched `moe` index inside the
# weight index_maps. Route/noise projections are fused into one (D, 2E) matmul.
# ---------------------------------------------------------------------------
def router_kernel(moe_ref, x_ref, noise_ref, w_ref, b_ref, g_ref,
                  *, top_k, num_experts):
    del moe_ref                      # consumed by the index_maps, not the body
    x = x_ref[0]                     # (T, D)   compute dtype
    noise = noise_ref[0]             # (T, E)   f32
    w = w_ref[0]                     # (D, 2E)  compute dtype
    b = b_ref[0]                     # (1, 2E)  f32

    both = jnp.dot(x, w, preferred_element_type=jnp.float32) + b   # (T, 2E)
    logits = both[:, :num_experts]
    nlog = both[:, num_experts:]

    # Stable softplus. (log(1+eps) vs log1p(eps) differs by < 1e-7 abs for the
    # eps = exp(-|x|) <= 1 range; kept in this form for guaranteed lowering.)
    sp = jnp.maximum(nlog, 0.0) + jnp.log(1.0 + jnp.exp(-jnp.abs(nlog)))
    noisy = logits + noise * sp

    # top-k mask (k static & tiny), softmax over kept entries only.
    neg = jnp.float32(-1e30)
    work = noisy
    for _ in range(top_k - 1):
        cur = jnp.max(work, axis=-1, keepdims=True)
        work = jnp.where(work >= cur, neg, work)
    kth = jnp.max(work, axis=-1, keepdims=True)
    masked = jnp.where(noisy >= kth, noisy, neg)

    m = jnp.max(masked, axis=-1, keepdims=True)
    p = jnp.exp(masked - m)          # exactly 0 outside top-k
    g = p / jnp.sum(p, axis=-1, keepdims=True)
    g_ref[0] = g.astype(g_ref.dtype)


# ---------------------------------------------------------------------------
# Kernel 2a (fused path): all experts in two wide MXU passes per token tile.
# ---------------------------------------------------------------------------
def experts_fused_kernel(x_ref, g_ref, sel_ref, w1_ref, b1_ref, w2_ref, b2_ref,
                         o_ref):
    x = x_ref[...]                                  # (tm, D)    compute dtype
    g = g_ref[...]                                  # (tm, E)    f32
    # one wide matmul over all experts' first layers: (tm, D) @ (D, Ne*H)
    h = jnp.dot(x, w1_ref[...], preferred_element_type=jnp.float32) + b1_ref[...]
    h = jnp.maximum(h, 0.0)
    # broadcast gating onto each expert's H-slice with a tiny selector matmul
    # (sel[e, e*H:(e+1)*H] == 1); avoids a (tm, Ne, H) relayout.
    g_big = jnp.dot(g, sel_ref[...], preferred_element_type=jnp.float32)
    h = (h * g_big).astype(x.dtype)                 # keep MXU-native dtype
    # one wide matmul over all experts' second layers: (tm, Ne*H) @ (Ne*H, D)
    y = jnp.dot(h, w2_ref[...], preferred_element_type=jnp.float32)
    y = y + jnp.dot(g, b2_ref[...], preferred_element_type=jnp.float32)
    o_ref[...] = y.astype(o_ref.dtype)


# ---------------------------------------------------------------------------
# Kernel 2b (expert-tiled path): VMEM-bounded fallback for large D/H (v7x).
# grid = (token tiles, Ne); expert axis innermost + "arbitrary"; f32 acc scratch.
# ---------------------------------------------------------------------------
def experts_tiled_kernel(x_ref, g_ref, w1_ref, b1_ref, w2_ref, b2_ref, o_ref,
                         acc_ref):
    e = pl.program_id(1)

    @pl.when(e == 0)
    def _():
        acc_ref[...] = jnp.zeros_like(acc_ref)

    x = x_ref[...]                                  # (tm, D)
    g = g_ref[...]                                  # (tm, E) f32
    # per-expert gating column without a dynamic lane slice
    col = jax.lax.broadcasted_iota(jnp.int32, g.shape, 1)
    g_e = jnp.sum(jnp.where(col == e, g, 0.0), axis=-1, keepdims=True)   # (tm,1)

    h = jnp.dot(x, w1_ref[0], preferred_element_type=jnp.float32) + b1_ref[0]
    h = jnp.maximum(h, 0.0)
    h = (h * g_e).astype(x.dtype)
    y = jnp.dot(h, w2_ref[0], preferred_element_type=jnp.float32)
    acc_ref[...] += y + g_e * b2_ref[0]

    @pl.when(e == pl.num_programs(1) - 1)
    def _():
        o_ref[...] = acc_ref[...].astype(o_ref.dtype)


# ---------------------------------------------------------------------------
# Parameter preparation (ONCE, outside the per-call path).
# ---------------------------------------------------------------------------
def prepare_params(router_params, expert_params, compute_dtype=jnp.float32):
    """Stack / pre-transpose PyTorch-layout params and cast big matmul weights to
    `compute_dtype` (use jnp.bfloat16 on v6e/v7x for ~2x MXU throughput and half
    the VMEM/HBM weight footprint). Biases, gating selector stay f32.
    Both the fused and per-expert layouts are materialized so either kernel path
    can be chosen at call time (in production keep only the one you need)."""
    wr = jnp.stack([p[0] for p in router_params])    # (R, E, D)
    br = jnp.stack([p[1] for p in router_params])    # (R, E)
    wn = jnp.stack([p[2] for p in router_params])
    bn = jnp.stack([p[3] for p in router_params])
    w1 = jnp.stack([p[0] for p in expert_params])    # (Ne, H, D)
    b1 = jnp.stack([p[1] for p in expert_params])    # (Ne, H)
    w2 = jnp.stack([p[2] for p in expert_params])    # (Ne, D, H)
    b2 = jnp.stack([p[3] for p in expert_params])    # (Ne, D)
    R, E, D = wr.shape
    Ne, H, _ = w1.shape

    # Router: one fused (D, 2E) projection per router = [logits | noise_logits].
    w_rn = jnp.concatenate(
        [jnp.swapaxes(wr, 1, 2), jnp.swapaxes(wn, 1, 2)], axis=-1
    ).astype(compute_dtype)                                       # (R, D, 2E)
    b_rn = jnp.concatenate([br, bn], axis=-1).reshape(R, 1, 2 * E).astype(jnp.float32)

    # Experts, fused layout (two wide MXU passes).
    w1_cat = jnp.transpose(w1, (2, 0, 1)).reshape(D, Ne * H).astype(compute_dtype)
    b1_cat = b1.reshape(1, Ne * H).astype(jnp.float32)
    w2_stk = jnp.swapaxes(w2, 1, 2).reshape(Ne * H, D).astype(compute_dtype)
    b2_stk = b2.astype(jnp.float32)                               # (E, D)
    sel = jnp.repeat(jnp.eye(Ne, dtype=jnp.float32), H, axis=1)   # (E, Ne*H)

    # Experts, per-expert layout for the expert-tiled (VMEM-bounded) path.
    w1_t = jnp.swapaxes(w1, 1, 2).astype(compute_dtype)           # (Ne, D, H)
    b1_r = b1.reshape(Ne, 1, H).astype(jnp.float32)
    w2_t = jnp.swapaxes(w2, 1, 2).astype(compute_dtype)           # (Ne, H, D)
    b2_r = b2.reshape(Ne, 1, D).astype(jnp.float32)

    return dict(
        compute_dtype=jnp.dtype(compute_dtype),
        num_experts=Ne, n_embed=D, hidden=H,
        w_rn=w_rn, b_rn=b_rn,
        w1_cat=w1_cat, b1_cat=b1_cat, w2_stk=w2_stk, b2_stk=b2_stk, sel=sel,
        w1_t=w1_t, b1_r=b1_r, w2_t=w2_t, b2_r=b2_r,
    )


# ---------------------------------------------------------------------------
# Experts wrapper: dense weighted mixture over flattened tokens.
# ---------------------------------------------------------------------------
def experts_mixture(flat_x, flat_g, params, *, tm=256, force_path=None):
    M, D = flat_x.shape
    Ne, H = params["num_experts"], params["hidden"]
    E = Ne
    cdt = params["compute_dtype"]
    flat_x = flat_x.astype(cdt)
    flat_g = flat_g.astype(jnp.float32)
    itm = jnp.dtype(cdt).itemsize

    if tm >= M:
        tm = M                      # single full-extent block (always legal)
    else:
        tm = max(8, (tm // 8) * 8)  # sublane-aligned token tile
    grid_m = pl.cdiv(M, tm)         # ragged last block handled by Pallas masking

    budget = _vmem_cap_bytes()
    # Fused path VMEM need (weights conservatively counted as double-buffered;
    # includes the f32 H_all / g_big / scaled intermediates).
    fused_w = 2 * D * Ne * H * itm + (Ne * H + E * Ne * H + E * D) * 4
    fused_act = (4 * tm * D * itm + 2 * tm * E * 4
                 + 3 * tm * Ne * H * 4 + tm * Ne * H * itm + 2 * tm * D * 4)
    fused_need = 2 * fused_w + fused_act

    path = force_path
    if path is None:
        path = "fused" if fused_need <= budget else "expert_tiled"

    cost = pl.CostEstimate(
        flops=4 * M * Ne * D * H,
        transcendentals=0,
        bytes_accessed=2 * D * Ne * H * itm + M * (2 * D * itm + E * 4),
    )

    if path == "fused":
        const2 = lambda i: (0, 0)
        return pl.pallas_call(
            experts_fused_kernel,
            out_shape=jax.ShapeDtypeStruct((M, D), cdt),
            grid_spec=pltpu.PrefetchScalarGridSpec(
                num_scalar_prefetch=0,
                grid=(grid_m,),
                in_specs=[
                    pl.BlockSpec((tm, D), lambda i: (i, 0)),      # x tile
                    pl.BlockSpec((tm, E), lambda i: (i, 0)),      # gating tile
                    pl.BlockSpec((E, Ne * H), const2),            # selector (resident)
                    pl.BlockSpec((D, Ne * H), const2),            # W1 concat (resident)
                    pl.BlockSpec((1, Ne * H), const2),            # b1 concat
                    pl.BlockSpec((Ne * H, D), const2),            # W2 stack (resident)
                    pl.BlockSpec((E, D), const2),                 # b2 stack
                ],
                out_specs=pl.BlockSpec((tm, D), lambda i: (i, 0)),
            ),
            compiler_params=pltpu.CompilerParams(
                dimension_semantics=("parallel",),
                vmem_limit_bytes=budget,
            ),
            cost_estimate=cost,
        )(flat_x, flat_g, params["sel"], params["w1_cat"], params["b1_cat"],
          params["w2_stk"], params["b2_stk"])

    # Expert-tiled accumulator path (weight VMEM capped at ~2 experts' worth).
    return pl.pallas_call(
        experts_tiled_kernel,
        out_shape=jax.ShapeDtypeStruct((M, D), cdt),
        grid_spec=pltpu.PrefetchScalarGridSpec(
            num_scalar_prefetch=0,
            grid=(grid_m, Ne),
            in_specs=[
                pl.BlockSpec((tm, D), lambda i, e: (i, 0)),
                pl.BlockSpec((tm, E), lambda i, e: (i, 0)),
                pl.BlockSpec((1, D, H), lambda i, e: (e, 0, 0)),
                pl.BlockSpec((1, 1, H), lambda i, e: (e, 0, 0)),
                pl.BlockSpec((1, H, D), lambda i, e: (e, 0, 0)),
                pl.BlockSpec((1, 1, D), lambda i, e: (e, 0, 0)),
            ],
            out_specs=pl.BlockSpec((tm, D), lambda i, e: (i, 0)),
            scratch_shapes=[pltpu.VMEM((tm, D), jnp.float32)],
        ),
        compiler_params=pltpu.CompilerParams(
            dimension_semantics=("parallel", "arbitrary"),
            vmem_limit_bytes=budget,
        ),
        cost_estimate=cost,
    )(flat_x, flat_g, params["w1_t"], params["b1_r"], params["w2_t"],
      params["b2_r"])


# ---------------------------------------------------------------------------
# Full forward
# ---------------------------------------------------------------------------
def sparse_moe_forward(x, moe, noise, params, *, top_k, tm=256, experts_path=None):
    """x: (B, T, D). moe: (B,) int router index per batch. noise: (B, T, E)~N(0,1)."""
    B, T, D = x.shape
    E = params["num_experts"]
    cdt = params["compute_dtype"]
    x = x.astype(cdt)
    moe = moe.astype(jnp.int32)
    noise = noise.astype(jnp.float32)
    itm = jnp.dtype(cdt).itemsize

    gating = pl.pallas_call(
        partial(router_kernel, top_k=top_k, num_experts=E),
        out_shape=jax.ShapeDtypeStruct((B, T, E), jnp.float32),
        grid_spec=pltpu.PrefetchScalarGridSpec(
            num_scalar_prefetch=1,
            grid=(B,),
            in_specs=[
                pl.BlockSpec((1, T, D), lambda b, m: (b, 0, 0)),
                pl.BlockSpec((1, T, E), lambda b, m: (b, 0, 0)),
                pl.BlockSpec((1, D, 2 * E), lambda b, m: (m[b], 0, 0)),
                pl.BlockSpec((1, 1, 2 * E), lambda b, m: (m[b], 0, 0)),
            ],
            out_specs=pl.BlockSpec((1, T, E), lambda b, m: (b, 0, 0)),
        ),
        compiler_params=pltpu.CompilerParams(
            dimension_semantics=("parallel",),      # shard batches across TCs (v7x)
            vmem_limit_bytes=_vmem_cap_bytes(),
        ),
        cost_estimate=pl.CostEstimate(
            flops=4 * B * T * D * E,
            transcendentals=3 * B * T * E,
            bytes_accessed=B * (T * D * itm + 3 * T * E * 4 + 2 * D * E * itm),
        ),
    )(moe, x, noise, params["w_rn"], params["b_rn"])

    out = experts_mixture(x.reshape(B * T, D), gating.reshape(B * T, E),
                          params, tm=tm, force_path=experts_path)
    return out.reshape(B, T, D)


# ---------------------------------------------------------------------------
# Deterministic parameter init (mirrors nn.Linear uniform(+-1/sqrt(fan_in)))
# ---------------------------------------------------------------------------
def _linear_params(key, out_f, in_f, dtype=jnp.float32):
    kw, kb = jax.random.split(key)
    bound = 1.0 / math.sqrt(in_f)
    w = jax.random.uniform(kw, (out_f, in_f), dtype, -bound, bound)
    b = jax.random.uniform(kb, (out_f,), dtype, -bound, bound)
    return w, b


def init_sparse_moe(key, n_embed, num_experts, dtype=jnp.float32):
    router_params, expert_params = [], []
    keys = jax.random.split(key, 2 * num_experts)
    for r in range(num_experts):
        k1, k2 = jax.random.split(keys[r])
        wr, br = _linear_params(k1, num_experts, n_embed, dtype)
        wn, bn = _linear_params(k2, num_experts, n_embed, dtype)
        router_params.append((wr, br, wn, bn))
    for e in range(num_experts):
        k1, k2 = jax.random.split(keys[num_experts + e])
        w1, b1 = _linear_params(k1, 4 * n_embed, n_embed, dtype)
        w2, b2 = _linear_params(k2, n_embed, 4 * n_embed, dtype)
        expert_params.append((w1, b1, w2, b2))
    return router_params, expert_params


# ---------------------------------------------------------------------------
# Pure-JAX faithful port of the PyTorch forward (for the correctness check)
# ---------------------------------------------------------------------------
def _reference_gating(x, moe, noise, router_params, top_k):
    B, T, _ = x.shape
    hp = jax.lax.Precision.HIGHEST
    gat, idxs = [], []
    for b in range(B):
        wr, br, wn, bn = router_params[int(moe[b])]
        logits = jnp.matmul(x[b], wr.T, precision=hp) + br
        nlog = jnp.matmul(x[b], wn.T, precision=hp) + bn
        sp = jnp.maximum(nlog, 0.0) + jnp.log1p(jnp.exp(-jnp.abs(nlog)))
        noisy = logits + noise[b] * sp
        vals, idx = jax.lax.top_k(noisy, top_k)
        sparse = jnp.full_like(noisy, -jnp.inf)
        sparse = sparse.at[jnp.arange(T)[:, None], idx].set(vals)
        gat.append(jax.nn.softmax(sparse, axis=-1))
        idxs.append(idx)
    return jnp.stack(gat), jnp.stack(idxs)


def _reference_experts(flat_x, flat_g, flat_i, expert_params):
    hp = jax.lax.Precision.HIGHEST
    final = jnp.zeros_like(flat_x)
    for e, (w1, b1, w2, b2) in enumerate(expert_params):
        h = jnp.maximum(jnp.matmul(flat_x, w1.T, precision=hp) + b1, 0.0)
        y = jnp.matmul(h, w2.T, precision=hp) + b2
        contrib = flat_g[:, e:e + 1] * y
        if flat_i is not None:
            mask = (flat_i == e).any(axis=-1)
            contrib = jnp.where(mask[:, None], contrib, 0.0)
        final = final + contrib
    return final


def sparse_moe_reference(x, moe, noise, router_params, expert_params, top_k):
    B, T, D = x.shape
    E = len(expert_params)
    gating, indices = _reference_gating(x, moe, noise, router_params, top_k)
    out = _reference_experts(x.reshape(-1, D), gating.reshape(-1, E),
                             indices.reshape(-1, top_k), expert_params)
    return out.reshape(B, T, D)


if __name__ == "__main__":
    key = jax.random.PRNGKey(0)
    kx, kp, km, kn = jax.random.split(key, 4)

    B, T = 2, 128
    n_embed = 128                 # D multiple of 128 -> lane-aligned tiles
    num_experts, top_k = 8, 2

    x = jax.random.normal(kx, (B, T, n_embed), dtype=jnp.float32)
    moe = jax.random.randint(km, (B,), 0, num_experts, dtype=jnp.int32)
    noise = jax.random.normal(kn, (B, T, num_experts), dtype=jnp.float32)

    router_params, expert_params = init_sparse_moe(kp, n_embed, num_experts)
    y_ref = sparse_moe_reference(x, moe, noise, router_params, expert_params, top_k)

    # --- f32, fused-wide-matmul path; tm=192 leaves a ragged last block so the
    #     no-host-pad masking path is exercised (M=256 -> 192 + 64-row blocks).
    params_f32 = prepare_params(router_params, expert_params, jnp.float32)
    y = jax.block_until_ready(
        sparse_moe_forward(x, moe, noise, params_f32, top_k=top_k, tm=192))
    assert y.shape == (B, T, n_embed)
    err = float(jnp.max(jnp.abs(y - y_ref)))
    assert jnp.allclose(y, y_ref, atol=2e-4, rtol=2e-4), f"fused f32 err={err}"

    # --- f32, expert-tiled accumulator path (VMEM-bounded fallback, e.g. v7x).
    y2 = jax.block_until_ready(
        sparse_moe_forward(x, moe, noise, params_f32, top_k=top_k, tm=128,
                           experts_path="expert_tiled"))
    err2 = float(jnp.max(jnp.abs(y2 - y_ref)))
    assert jnp.allclose(y2, y_ref, atol=2e-4, rtol=2e-4), f"tiled f32 err={err2}"

    # --- bf16 weights/activations (recommended on v6e/v7x). Top-k decisions can
    #     legitimately flip versus f32 when noisy logits are near-tied, so the
    #     full forward is checked for finiteness and the expert mixture is
    #     checked with gating held fixed.
    params_bf16 = prepare_params(router_params, expert_params, jnp.bfloat16)
    y_bf16 = jax.block_until_ready(
        sparse_moe_forward(x.astype(jnp.bfloat16), moe, noise, params_bf16,
                           top_k=top_k, tm=128))
    assert bool(jnp.all(jnp.isfinite(y_bf16.astype(jnp.float32))))

    gat32, _ = _reference_gating(x, moe, noise, router_params, top_k)
    flat_g = gat32.reshape(-1, num_experts)
    mix_bf16 = jax.block_until_ready(
        experts_mixture(x.reshape(-1, n_embed).astype(jnp.bfloat16), flat_g,
                        params_bf16, tm=128))
    mix_ref = _reference_experts(x.reshape(-1, n_embed), flat_g, None, expert_params)
    err3 = float(jnp.max(jnp.abs(mix_bf16.astype(jnp.float32) - mix_ref)))
    assert err3 < 0.08, f"bf16 experts err={err3}"

    print("KERNEL_OK")
</pallas_src>

<mosaic_0001>
module attributes {stable_mosaic.version = 11 : i64} {
  func.func @router_kernel(%arg0: i32, %arg1: memref<2xi32, #tpu.memory_space<smem>>, %arg2: memref<1x128x128xf32, #tpu.memory_space<vmem>>, %arg3: memref<1x128x8xf32, #tpu.memory_space<vmem>>, %arg4: memref<1x128x16xf32, #tpu.memory_space<vmem>>, %arg5: memref<1x1x16xf32, #tpu.memory_space<vmem>>, %arg6: memref<1x128x8xf32, #tpu.memory_space<vmem>>) attributes {dimension_semantics = [#tpu.dimension_semantics<parallel>], iteration_bounds = array<i64: 2>, scalar_prefetch = 1 : i64, scratch_operands = 0 : i64, tpu.core_type = #tpu.core_type<tc>, window_params = [{transform_indices = @transform_0, window_bounds = array<i64: 1, 128, 128>}, {transform_indices = @transform_1, window_bounds = array<i64: 1, 128, 8>}, {transform_indices = @transform_2, window_bounds = array<i64: 1, 128, 16>}, {transform_indices = @transform_3, window_bounds = array<i64: 1, 1, 16>}, {transform_indices = @transform_4, window_bounds = array<i64: 1, 128, 8>}]} {
    %c0 = arith.constant 0 : index
    %c0_0 = arith.constant 0 : index
    %c0_1 = arith.constant 0 : index
    %0 = vector.load %arg2[%c0, %c0_0, %c0_1] : memref<1x128x128xf32, #tpu.memory_space<vmem>>, vector<1x128x128xf32>
    %1 = vector.shape_cast %0 : vector<1x128x128xf32> to vector<128x128xf32>
    %c0_2 = arith.constant 0 : index
    %c0_3 = arith.constant 0 : index
    %c0_4 = arith.constant 0 : index
    %2 = vector.load %arg3[%c0_2, %c0_3, %c0_4] : memref<1x128x8xf32, #tpu.memory_space<vmem>>, vector<1x128x8xf32>
    %3 = vector.shape_cast %2 : vector<1x128x8xf32> to vector<128x8xf32>
    %c0_5 = arith.constant 0 : index
    %c0_6 = arith.constant 0 : index
    %c0_7 = arith.constant 0 : index
    %4 = vector.load %arg4[%c0_5, %c0_6, %c0_7] : memref<1x128x16xf32, #tpu.memory_space<vmem>>, vector<1x128x16xf32>
    %5 = vector.shape_cast %4 : vector<1x128x16xf32> to vector<128x16xf32>
    %c0_8 = arith.constant 0 : index
    %c0_9 = arith.constant 0 : index
    %c0_10 = arith.constant 0 : index
    %6 = vector.load %arg5[%c0_8, %c0_9, %c0_10] : memref<1x1x16xf32, #tpu.memory_space<vmem>>, vector<1x1x16xf32>
    %7 = vector.shape_cast %6 : vector<1x1x16xf32> to vector<1x16xf32>
    %cst = arith.constant dense<0.000000e+00> : vector<128x16xf32>
    %8 = tpu.matmul %1, %5, %cst {dimension_numbers = #tpu.dot_dimension_numbers<[1], [0], [0], [1], [0, 0, 1, 1], [], []>} : vector<128x128xf32>, vector<128x16xf32>, vector<128x16xf32> -> vector<128x16xf32>
    %9 = vector.broadcast %7 : vector<1x16xf32> to vector<128x16xf32>
    %10 = arith.addf %8, %9 : vector<128x16xf32>
    %11 = vector.extract_strided_slice %10 {offsets = [0, 0], sizes = [128, 8], strides = [1, 1]} : vector<128x16xf32> to vector<128x8xf32>
    %12 = vector.extract_strided_slice %10 {offsets = [0, 8], sizes = [128, 8], strides = [1, 1]} : vector<128x16xf32> to vector<128x8xf32>
    %cst_11 = arith.constant 0.000000e+00 : f32
    %13 = vector.broadcast %cst_11 : f32 to vector<128x8xf32>
    %14 = arith.maximumf %12, %13 : vector<128x8xf32>
    %15 = math.absf %12 : vector<128x8xf32>
    %cst_12 = arith.constant 0.000000e+00 : f32
    %16 = vector.broadcast %cst_12 : f32 to vector<128x8xf32>
    %17 = arith.subf %16, %15 : vector<128x8xf32>
    %18 = math.exp %17 : vector<128x8xf32>
    %cst_13 = arith.constant 1.000000e+00 : f32
    %19 = vector.broadcast %cst_13 : f32 to vector<128x8xf32>
    %20 = arith.addf %19, %18 : vector<128x8xf32>
    %21 = math.log %20 : vector<128x8xf32>
    %22 = arith.addf %14, %21 : vector<128x8xf32>
    %23 = arith.mulf %3, %22 : vector<128x8xf32>
    %24 = arith.addf %11, %23 : vector<128x8xf32>
    %cst_14 = arith.constant dense<0xFF800000> : vector<128xf32>
    %25 = vector.multi_reduction <maximumf>, %24, %cst_14 [1] : vector<128x8xf32> to vector<128xf32>
    %26 = vector.shape_cast %25 : vector<128xf32> to vector<128x1xf32>
    %27 = vector.broadcast %26 : vector<128x1xf32> to vector<128x8xf32>
    %28 = arith.cmpf oge, %24, %27 : vector<128x8xf32>
    %cst_15 = arith.constant -1.000000e+30 : f32
    %29 = vector.broadcast %cst_15 : f32 to vector<128x8xf32>
    %30 = arith.select %28, %29, %24 : vector<128x8xi1>, vector<128x8xf32>
    %cst_16 = arith.constant dense<0xFF800000> : vector<128xf32>
    %31 = vector.multi_reduction <maximumf>, %30, %cst_16 [1] : vector<128x8xf32> to vector<128xf32>
    %32 = vector.shape_cast %31 : vector<128xf32> to vector<128x1xf32>
    %33 = vector.broadcast %32 : vector<128x1xf32> to vector<128x8xf32>
    %34 = arith.cmpf oge, %24, %33 : vector<128x8xf32>
    %cst_17 = arith.constant -1.000000e+30 : f32
    %35 = vector.broadcast %cst_17 : f32 to vector<128x8xf32>
    %36 = arith.select %34, %24, %35 : vector<128x8xi1>, vector<128x8xf32>
    %cst_18 = arith.constant dense<0xFF800000> : vector<128xf32>
    %37 = vector.multi_reduction <maximumf>, %36, %cst_18 [1] : vector<128x8xf32> to vector<128xf32>
    %38 = vector.shape_cast %37 : vector<128xf32> to vector<128x1xf32>
    %39 = vector.broadcast %38 : vector<128x1xf32> to vector<128x8xf32>
    %40 = arith.subf %36, %39 : vector<128x8xf32>
    %41 = math.exp %40 : vector<128x8xf32>
    %cst_19 = arith.constant dense<0.000000e+00> : vector<128xf32>
    %42 = vector.multi_reduction <add>, %41, %cst_19 [1] : vector<128x8xf32> to vector<128xf32>
    %43 = vector.shape_cast %42 : vector<128xf32> to vector<128x1xf32>
    %44 = vector.broadcast %43 : vector<128x1xf32> to vector<128x8xf32>
    %45 = arith.divf %41, %44 : vector<128x8xf32>
    %c0_20 = arith.constant 0 : index
    %c0_21 = arith.constant 0 : index
    %c0_22 = arith.constant 0 : index
    %46 = vector.load %arg6[%c0_20, %c0_21, %c0_22] : memref<1x128x8xf32, #tpu.memory_space<vmem>>, vector<1x128x8xf32>
    %47 = vector.shape_cast %46 : vector<1x128x8xf32> to vector<128x8xf32>
    %48 = vector.shape_cast %45 : vector<128x8xf32> to vector<1x128x8xf32>
    tpu.vector_store %arg6[%c0_20, %c0_21, %c0_22], %48 {strides = array<i32>} : memref<1x128x8xf32, #tpu.memory_space<vmem>>, vector<1x128x8xf32>,
    return
  }
  func.func @transform_0(%arg0: i32, %arg1: memref<2xi32, #tpu.memory_space<smem>>) -> (i32, i32, i32) {
    %c0_i32 = arith.constant 0 : i32
    %c0_i32_0 = arith.constant 0 : i32
    %c0_i32_1 = arith.constant 0 : i32
    return %arg0, %c0_i32, %c0_i32_0 : i32, i32, i32
  }
  func.func @transform_1(%arg0: i32, %arg1: memref<2xi32, #tpu.memory_space<smem>>) -> (i32, i32, i32) {
    %c0_i32 = arith.constant 0 : i32
    %c0_i32_0 = arith.constant 0 : i32
    %c0_i32_1 = arith.constant 0 : i32
    return %arg0, %c0_i32, %c0_i32_0 : i32, i32, i32
  }
  func.func @transform_2(%arg0: i32, %arg1: memref<2xi32, #tpu.memory_space<smem>>) -> (i32, i32, i32) {
    %0 = arith.index_cast %arg0 : i32 to index
    %1 = memref.load %arg1[%0] : memref<2xi32, #tpu.memory_space<smem>>
    %c0_i32 = arith.constant 0 : i32
    %c0_i32_0 = arith.constant 0 : i32
    %c0_i32_1 = arith.constant 0 : i32
    return %1, %c0_i32, %c0_i32_0 : i32, i32, i32
  }
  func.func @transform_3(%arg0: i32, %arg1: memref<2xi32, #tpu.memory_space<smem>>) -> (i32, i32, i32) {
    %0 = arith.index_cast %arg0 : i32 to index
    %1 = memref.load %arg1[%0] : memref<2xi32, #tpu.memory_space<smem>>
    %c0_i32 = arith.constant 0 : i32
    %c0_i32_0 = arith.constant 0 : i32
    %c0_i32_1 = arith.constant 0 : i32
    return %1, %c0_i32, %c0_i32_0 : i32, i32, i32
  }
  func.func @transform_4(%arg0: i32, %arg1: memref<2xi32, #tpu.memory_space<smem>>) -> (i32, i32, i32) {
    %c0_i32 = arith.constant 0 : i32
    %c0_i32_0 = arith.constant 0 : i32
    %c0_i32_1 = arith.constant 0 : i32
    return %arg0, %c0_i32, %c0_i32_0 : i32, i32, i32
  }
}

</mosaic_0001>

<bundles_post_ra>
// kernel: tpu_custom_call.1
= control target key start
LH: loop header
LB: loop body
LE: loop exit
PB: predicated region body
PF: predicated region fallthrough
CT: control target
= control target key end

     0   :  { %s2048_s0 = inlined_call_operand.vmem [shape: s32[2], index: 0, kind: input, shape index: {}]   ;;  %s2049_s1 = inlined_call_operand.vmem [shape: f32[2,128,128], index: 1, kind: input, shape index: {}]   ;;  %s2050_s2 = inlined_call_operand.vmem [shape: f32[2,128,8], index: 2, kind: input, shape index: {}]   ;;  %s2051_s3 = inlined_call_operand.vmem [shape: f32[8,128,16], index: 3, kind: input, shape index: {}]   ;;  %s2052_s4 = inlined_call_operand.vmem [shape: f32[8,1,16], index: 4, kind: input, shape index: {}]   ;;  %s2053_s5 = inlined_call_operand.vmem [shape: f32[2,128,8], index: 5, kind: output, shape index: {}]  }
   0x1   :  { %s10_s20 = sshll.u32 %s2048_s0, 4  ;;  %s11_s20 = int_to_ptr.vmem [resolvable:$true] %s10_s20 }
   0x2   :  { %s1448_s21 = scalar_lea.vmem %s11_s20, 16  ;;  %p1453_p1 = scmp.lt.s32.totalorder %s11_s20, %s11_s20 }
   0x3   :  { %p1449_p0 = scmp.ne.s32.totalorder %s11_s20, %s1448_s21  ;;  %p1454_p2 = scmp.lt.s32.totalorder %s1448_s21, %s1448_s21 }
   0x5   :  { %p1455_p3 = por %p1454_p2, %p1453_p1 }
   0x7   :  { %p1456_p4 = pnand %p1455_p3, %p1449_p0 }
   0x9   :  { %1459 = shalt.err (!%p1456_p4)  }
   0xa   :  { %s1470_s22 = smov [#allocation3]  }
   0xb   :  { %13 = dma.vmem_to_smem %s11_s20, 16, %s1470_s22, [#allocation2] }
   0xc   :  { %1464 = dma.done.wait [#allocation2], 16 }
   0xd   :  { %1465 = vsyncadd [#allocation2], 4294967280 }
   0xe   :  { %15 = sfence }
   0xf   :  { %s1505_s23 = smov 0  }
  0x10 LB: > { %s1511_s0 = sadd.s32 4294967295, %s1468_s23   ;;  %p1158_p5 = scmp.ge.s32.totalorder %s1468_s23, 1  ;;  %s1468_s23 = sphi %s1505_s23, %s21_s23  }
  0x11   : > { %p205_p6 = scmp.lt.s32.totalorder %s1468_s23, 3 }
  0x13   : > { %p206_p7 = pnand %p1158_p5, %p205_p6 }
  0x14   : > { %s256_s24 = sld [smem:[#allocation3 + %s1511_s0]] (!%p206_p7)  ;;  %p246_p8 = scmp.lt.s32.totalorder (!%p206_p7), %s1511_s0, 1  ;;  %vm713_vm0 = vcmask (!%p206_p7), 64512  }
  0x15   : > { %209 = sbr.rel (%p206_p7) target bundleno = 1082 (0x43a), region = 36  ;;  %s263_s9 = sld [smem:[#allocation3 + %s1511_s0]] (!%p206_p7) }
  0x16   : > { %s1471_s13 = smov (!%p206_p7), 120  }
  0x1a   : > { %p257_p9 = scmp.lt.s32.totalorder (!%p206_p7), %s256_s24, 7 }
  0x1b   : > { %p264_p10 = scmp.lt.s32.totalorder (!%p206_p7), %s263_s9, 7 }
  0x1c   : > { %s247_s25 = scalar_select %p246_p8, %s1511_s0, 1 }
  0x1d   : > { %s2055_s24 = smov (!%p257_p9, %s256_s24), 7  ;;  %s2057_s9 = smov (!%p264_p10, %s263_s9), 7 }
  0x1e   : > { %s1518_s26 = sshll.u32 %s247_s25, 7  ;;  %s1172_s30 = sshll.u32 %s2055_s24, 7 }
  0x1f   : > { %s1524_s29 = scalar_lea.vmem %s2049_s1, %s1518_s26  ;;  %s1531_s8 = scalar_lea.vmem %s2051_s3, %s1172_s30 }
  0x20   : > { %v273_v0 = vld [vmem:[%s1524_s29] sm:$0xff]  ;;  %v306_v3 = vld [vmem:[%s1531_s8 + $0x8] sm:$0xff]  ;;  %v307_v4 = vld [vmem:[%s1531_s8 + $0x10] sm:$0xff]  ;;  %s266_s12 = scalar_lea.vmem %s2052_s4, %s2057_s9  ;;  %s1669_s16 = scalar_lea.vmem %s2050_s2, %s1518_s26 }
  0x21   : > { %v281_v1 = vld [vmem:[%s1524_s29 + $0x40] sm:$0xff]  ;;  %1238 = vmatprep.mubr.f32.mxu0 %v273_v0  ;;  %v308_v6 = vld [vmem:[%s1531_s8 + $0x18] sm:$0xff]  ;;  %v310_v9 = vld [vmem:[%s1531_s8 + $0x28] sm:$0xff]  ;;  %s1995_s19 = scalar_lea.vmem %s2053_s5, %s1518_s26 }
  0x22   : > { %1250 = vmatprep.mubr.f32.mxu1 %v281_v1  ;;  %v305_v2 = vld [vmem:[%s1531_s8] sm:$0xff]  ;;  %v1266_v7 = vpack.c.bf16 %v308_v6, %v307_v4  ;;  %v311_v11 = vld [vmem:[%s1531_s8 + $0x30] sm:$0xff]  ;;  %v312_v12 = vld [vmem:[%s1531_s8 + $0x38] sm:$0xff] }
  0x23   : > { %v1262_v5 = vpack.c.bf16 %v306_v3, %v305_v2  ;;  %v309_v8 = vld [vmem:[%s1531_s8 + $0x20] sm:$0xff]  ;;  %v1274_v13 = vpack.c.bf16 %v312_v12, %v311_v11  ;;  %v314_v15 = vld [vmem:[%s1531_s8 + $0x48] sm:$0xff]  ;;  %v315_v17 = vld [vmem:[%s1531_s8 + $0x50] sm:$0xff] }
  0x24   : > { %v1270_v10 = vpack.c.bf16 %v310_v9, %v309_v8  ;;  %v313_v14 = vld [vmem:[%s1531_s8 + $0x40] sm:$0xff]  ;;  %v316_v18 = vld [vmem:[%s1531_s8 + $0x58] sm:$0xff]  ;;  %v318_v21 = vld [vmem:[%s1531_s8 + $0x68] sm:$0xff] }
  0x25   : > { %1263 = vmatprep.subr.bf16.mxu0 %v1262_v5  ;;  %1294 = vmatprep.subr.bf16.mxu1 %v1262_v5  ;;  %v1278_v16 = vpack.c.bf16 %v314_v15, %v313_v14  ;;  %v1282_v19 = vpack.c.bf16 %v316_v18, %v315_v17  ;;  %v317_v20 = vld [vmem:[%s1531_s8 + $0x60] sm:$0xff]  ;;  %v319_v23 = vld [vmem:[%s1531_s8 + $0x70] sm:$0xff]  ;;  %v320_v24 = vld [vmem:[%s1531_s8 + $0x78] sm:$0xff] }
  0x26   : > { %1265 = vmatpush3.bf16.msra.mxu0 %v1262_v5  ;;  %1302 = vmatpush3.bf16.msra.mxu1 %v1262_v5  ;;  %v1286_v22 = vpack.c.bf16 %v318_v21, %v317_v20  ;;  %v1290_v25 = vpack.c.bf16 %v320_v24, %v319_v23  ;;  %v274_v26 = vld [vmem:[%s1524_s29 + $0x8] sm:$0xff]  ;;  %v275_v28 = vld [vmem:[%s1524_s29 + $0x10] sm:$0xff]  ;;  %v276_v30 = vld [vmem:[%s1524_s29 + $0x18] sm:$0xff] }
  0x27   : > { %1267 = vmatprep.subr.bf16.mxu0 %v1266_v7  ;;  %1295 = vmatprep.subr.bf16.mxu1 %v1266_v7  ;;  %v282_v27 = vld [vmem:[%s1524_s29 + $0x48] sm:$0xff]  ;;  %v283_v29 = vld [vmem:[%s1524_s29 + $0x50] sm:$0xff]  ;;  %v284_v31 = vld [vmem:[%s1524_s29 + $0x58] sm:$0xff] }
  0x28   : > { %v277_v32 = vld [vmem:[%s1524_s29 + $0x20] sm:$0xff]  ;;  %v278_v34 = vld [vmem:[%s1524_s29 + $0x28] sm:$0xff]  ;;  %v279_v36 = vld [vmem:[%s1524_s29 + $0x30] sm:$0xff] }
  0x29   : > { %v285_v33 = vld [vmem:[%s1524_s29 + $0x60] sm:$0xff]  ;;  %v286_v35 = vld [vmem:[%s1524_s29 + $0x68] sm:$0xff]  ;;  %v287_v37 = vld [vmem:[%s1524_s29 + $0x70] sm:$0xff] }
  0x2a   : > { %1269 = vmatpush3.bf16.msra.mxu0 %v1266_v7  ;;  %1303 = vmatpush3.bf16.msra.mxu1 %v1266_v7  ;;  %v280_v38 = vld [vmem:[%s1524_s29 + $0x38] sm:$0xff]  ;;  %v1567_v40 = vld [vmem:[%s266_s12] ss:$0 sm:$0xff] }
  0x2b   : > { %1271 = vmatprep.subr.bf16.mxu0 %v1270_v10  ;;  %1296 = vmatprep.subr.bf16.mxu1 %v1270_v10  ;;  %v288_v39 = vld [vmem:[%s1524_s29 + $0x78] sm:$0xff] }
  0x2e   : > { %1273 = vmatpush3.bf16.msra.mxu0 %v1270_v10  ;;  %1304 = vmatpush3.bf16.msra.mxu1 %v1270_v10 }
  0x2f   : > { %1275 = vmatprep.subr.bf16.mxu0 %v1274_v13  ;;  %1297 = vmatprep.subr.bf16.mxu1 %v1274_v13 }
  0x32   : > { %1277 = vmatpush3.bf16.msra.mxu0 %v1274_v13  ;;  %1305 = vmatpush3.bf16.msra.mxu1 %v1274_v13 }
  0x33   : > { %1279 = vmatprep.subr.bf16.mxu0 %v1278_v16  ;;  %1298 = vmatprep.subr.bf16.mxu1 %v1278_v16 }
  0x36   : > { %1281 = vmatpush3.bf16.msra.mxu0 %v1278_v16  ;;  %1306 = vmatpush3.bf16.msra.mxu1 %v1278_v16 }
  0x37   : > { %1283 = vmatprep.subr.bf16.mxu0 %v1282_v19  ;;  %1299 = vmatprep.subr.bf16.mxu1 %v1282_v19 }
  0x3a   : > { %1285 = vmatpush3.bf16.msra.mxu0 %v1282_v19  ;;  %1307 = vmatpush3.bf16.msra.mxu1 %v1282_v19 }
  0x3b   : > { %1287 = vmatprep.subr.bf16.mxu0 %v1286_v22  ;;  %1300 = vmatprep.subr.bf16.mxu1 %v1286_v22 }
  0x3e   : > { %1289 = vmatpush3.bf16.msra.mxu0 %v1286_v22  ;;  %1308 = vmatpush3.bf16.msra.mxu1 %v1286_v22 }
  0x3f   : > { %1291 = vmatprep.subr.bf16.mxu0 %v1290_v25  ;;  %1301 = vmatprep.subr.bf16.mxu1 %v1290_v25 }
  0x42   : > { %1293 = vmatpush3.bf16.msra.mxu0 %v1290_v25  ;;  %1309 = vmatpush3.bf16.msra.mxu1 %v1290_v25 }
  0x45   : > { %1239 = vmatmul.mubr.f32.vlgmr.msra.gmra.mrb[0].mxu0 %v274_v26  ;;  %1251 = vmatmul.mubr.f32.vlgmr.msra.gmra.mrb[0].mxu1 %v282_v27 }
  0x46   : > { %1241 = vmatprep.mubr.f32.mxu0 %v275_v28  ;;  %1253 = vmatprep.mubr.f32.mxu1 %v283_v29 }
  0x49   : > { %1242 = vmatmul.mubr.f32.gmra.mrb[2].mxu0 %v276_v30  ;;  %1254 = vmatmul.mubr.f32.gmra.mrb[2].mxu1 %v284_v31 }
  0x4a   : > { %1244 = vmatprep.mubr.f32.mxu0 %v277_v32  ;;  %1256 = vmatprep.mubr.f32.mxu1 %v285_v33 }
  0x4d   : > { %1245 = vmatmul.mubr.f32.gmra.mrb[4].mxu0 %v278_v34  ;;  %1257 = vmatmul.mubr.f32.gmra.mrb[4].mxu1 %v286_v35 }
  0x4e   : > { %1247 = vmatprep.mubr.f32.mxu0 %v279_v36  ;;  %1259 = vmatprep.mubr.f32.mxu1 %v287_v37 }
  0x51   : > { %1248 = vmatmul.mubr.f32.gmra.mrb[6].mxu0 %v280_v38  ;;  %1260 = vmatmul.mubr.f32.gmra.mrb[6].mxu1 %v288_v39 }
 0x118   : > { %v1240_v41 = vpop.f32.mrb[0].mxu0  ;;  %v1252_v42 = vpop.f32.mrb[0].mxu1 }
 0x119   : > { %v1570_v43 = vadd.f32 %v1240_v41, %v1567_v40  ;;  %v1573_v44 = vadd.f32 %v1252_v42, %v1567_v40  ;;  %v394_v45 = vpop.f32.mrb[1].mxu0  ;;  %v434_v46 = vpop.f32.mrb[1].mxu1 }
 0x11a   : > { %v1576_v47 = vadd.f32 %v1567_v40, %v394_v45  ;;  %v1579_v48 = vadd.f32 %v1567_v40, %v434_v46 }
 0x11b   : > { %v490_v49 = vand.u32 2147483647, %v1570_v43  ;;  %v498_v50 = vand.u32 2147483647, %v1573_v44 }
 0x11c   : > { %v489_v51 = vand.u32 2147483647, %v1576_v47  ;;  %v497_v52 = vand.u32 2147483647, %v1579_v48  ;;  %v1243_v55 = vpop.f32.mrb[2].mxu0  ;;  %v1255_v56 = vpop.f32.mrb[2].mxu1 }
 0x11d   : > { %v506_v53 = vsub.f32 0.0, %v490_v49  ;;  %v514_v54 = vsub.f32 0.0, %v498_v50  ;;  %v1586_v59 = vadd.f32 %v1243_v55, %v1567_v40  ;;  %v1589_v60 = vadd.f32 %v1255_v56, %v1567_v40  ;;  %v404_v61 = vpop.f32.mrb[3].mxu0  ;;  %v444_v62 = vpop.f32.mrb[3].mxu1 }
 0x11e   : > { %v505_v57 = vsub.f32 0.0, %v489_v51  ;;  %v513_v58 = vsub.f32 0.0, %v497_v52  ;;  %v1592_v1 = vadd.f32 %v1567_v40, %v404_v61  ;;  %v1595_v2 = vadd.f32 %v1567_v40, %v444_v62 }
 0x11f   : > { %v523_v63 = vmul.f32 1.442695, %v506_v53  ;;  %v539_v0 = vmul.f32 1.442695, %v514_v54  ;;  %v492_v5 = vand.u32 2147483647, %v1586_v59 }
 0x120   : > { %v521_v3 = vmul.f32 1.442695, %v505_v57  ;;  %v537_v4 = vmul.f32 1.442695, %v513_v58  ;;  %v500_v6 = vand.u32 2147483647, %v1589_v60 }
 0x121   : > { %v1246_v7 = vpop.f32.mrb[4].mxu0  ;;  %1320 = vpow2.f32 %v539_v0  ;;  %v491_v8 = vand.u32 2147483647, %v1592_v1  ;;  %v499_v9 = vand.u32 2147483647, %v1595_v2  ;;  %v1258_v10 = vpop.f32.mrb[4].mxu1 }
 0x122   : > { %1322 = vpow2.f32 %v523_v63  ;;  %v508_v11 = vsub.f32 0.0, %v492_v5  ;;  %v516_v12 = vsub.f32 0.0, %v500_v6  ;;  %v1602_v13 = vadd.f32 %v1246_v7, %v1567_v40  ;;  %v414_v14 = vpop.f32.mrb[5].mxu0  ;;  %v454_v15 = vpop.f32.mrb[5].mxu1 }
 0x123   : > { %1324 = vpow2.f32 %v521_v3  ;;  %v507_v16 = vsub.f32 0.0, %v491_v8  ;;  %v515_v17 = vsub.f32 0.0, %v499_v9  ;;  %v1605_v18 = vadd.f32 %v1258_v10, %v1567_v40 }
 0x124   : > { %v1249_v19 = vpop.f32.mrb[6].mxu0  ;;  %v1261_v20 = vpop.f32.mrb[6].mxu1  ;;  %1326 = vpow2.f32 %v537_v4  ;;  %v527_v21 = vmul.f32 1.442695, %v508_v11  ;;  %v543_v22 = vmul.f32 1.442695, %v516_v12  ;;  %v1608_v23 = vadd.f32 %v1567_v40, %v414_v14 }
 0x125   : > { %v424_v24 = vpop.f32.mrb[7].mxu0  ;;  %v525_v25 = vmul.f32 1.442695, %v507_v16  ;;  %v541_v26 = vmul.f32 1.442695, %v515_v17  ;;  %v1612_v28 = vadd.f32 %v1567_v40, %v454_v15  ;;  %v464_v30 = vpop.f32.mrb[7].mxu1  ;;  %v1618_v35 = vadd.f32 %v1249_v19, %v1567_v40 }
 0x126   : > { %v494_v27 = vand.u32 2147483647, %v1602_v13  ;;  %1328 = vpow2.f32 %v527_v21  ;;  %v502_v29 = vand.u32 2147483647, %v1605_v18  ;;  %v493_v32 = vand.u32 2147483647, %v1608_v23 }
 0x127   : > { %1330 = vpow2.f32 %v543_v22  ;;  %v501_v34 = vand.u32 2147483647, %v1612_v28  ;;  %v1621_v38 = vadd.f32 %v1261_v20, %v1567_v40  ;;  %v496_v42 = vand.u32 2147483647, %v1618_v35 }
 0x128   : > { %v510_v31 = vsub.f32 0.0, %v494_v27  ;;  %1332 = vpow2.f32 %v525_v25  ;;  %v518_v33 = vsub.f32 0.0, %v502_v29  ;;  %v509_v37 = vsub.f32 0.0, %v493_v32 }
 0x129   : > { %1334 = vpow2.f32 %v541_v26  ;;  %v517_v41 = vsub.f32 0.0, %v501_v34  ;;  %v504_v49 = vand.u32 2147483647, %v1621_v38  ;;  %v512_v52 = vsub.f32 0.0, %v496_v42 }
 0x12a   : > { %v531_v36 = vmul.f32 1.442695, %v510_v31  ;;  %v547_v39 = vmul.f32 1.442695, %v518_v33  ;;  %v529_v46 = vmul.f32 1.442695, %v509_v37  ;;  %v1626_v53 = vadd.f32 %v1567_v40, %v424_v24 }
 0x12b   : > { %v1321_v45 = vpop.eup %1320  ;;  %v545_v51 = vmul.f32 1.442695, %v517_v41  ;;  %v520_v55 = vsub.f32 0.0, %v504_v49  ;;  %v1629_v56 = vadd.f32 %v1567_v40, %v464_v30  ;;  %v535_v61 = vmul.f32 1.442695, %v512_v52 }
 0x12c   : > { %1336 = vpow2.f32 %v531_v36  ;;  %v1323_v50 = vpop.eup %1322  ;;  %v562_v57 = vadd.f32 1.0, %v1321_v45  ;;  %v495_v62 = vand.u32 2147483647, %v1626_v53  ;;  %v482_v27 = vmax.f32 %v1573_v44, 0.0 }
 0x12d   : > { %1338 = vpow2.f32 %v547_v39  ;;  %v1325_v54 = vpop.eup %1324  ;;  %v551_v63 = vmul.f32 1.442695, %v520_v55  ;;  %v503_v0 = vand.u32 2147483647, %v1629_v56  ;;  %v554_v5 = vadd.f32 1.0, %v1323_v50 }
 0x12e   : > { %1340 = vpow2.f32 %v529_v46  ;;  %v1327_v58 = vpop.eup %1326  ;;  %v511_v4 = vsub.f32 0.0, %v495_v62  ;;  %v553_v10 = vadd.f32 1.0, %v1325_v54  ;;  %v474_v37 = vmax.f32 %v1570_v43, 0.0 }
 0x12f   : > { %1342 = vpow2.f32 %v545_v51  ;;  %v519_v7 = vsub.f32 0.0, %v503_v0  ;;  %v561_v15 = vadd.f32 1.0, %v1327_v58  ;;  %v476_v42 = vmax.f32 %v1586_v59, 0.0 }
 0x130   : > { %1344 = vlog2.f32 %v562_v57  ;;  %v1329_v3 = vpop.eup %1328  ;;  %v533_v9 = vmul.f32 1.442695, %v511_v4  ;;  %v473_v57 = vmax.f32 %v1576_v47, 0.0  ;;  %v484_v62 = vmax.f32 %v1589_v60, 0.0 }
 0x131   : > { %1346 = vpow2.f32 %v535_v61  ;;  %v1331_v6 = vpop.eup %1330  ;;  %v556_v8 = vadd.f32 1.0, %v1329_v3  ;;  %v549_v12 = vmul.f32 1.442695, %v519_v7 }
 0x132   : > { %1348 = vpow2.f32 %v551_v63  ;;  %v1333_v40 = vpop.eup %1332  ;;  %v564_v14 = vadd.f32 1.0, %v1331_v6 }
 0x133   : > { %1350 = vlog2.f32 %v554_v5  ;;  %v1335_v11 = vpop.eup %1334  ;;  %v555_v17 = vadd.f32 1.0, %v1333_v40 }
 0x134   : > { %1352 = vlog2.f32 %v556_v8  ;;  %v563_v20 = vadd.f32 1.0, %v1335_v11  ;;  %v475_v11 = vmax.f32 %v1592_v1, 0.0 }
 0x135   : > { %1354 = vpow2.f32 %v533_v9 }
 0x136   : > { %v1337_v16 = vpop.eup %1336  ;;  %1356 = vpow2.f32 %v549_v12 }
 0x137   : > { %v1339_v19 = vpop.eup %1338  ;;  %1358 = vlog2.f32 %v553_v10  ;;  %v558_v22 = vadd.f32 1.0, %v1337_v16  ;;  %v481_v10 = vmax.f32 %v1579_v48, 0.0 }
 0x138   : > { %v1341_v21 = vpop.eup %1340  ;;  %1360 = vlog2.f32 %v564_v14  ;;  %v566_v32 = vadd.f32 1.0, %v1339_v19 }
 0x139   : > { %v1343_v24 = vpop.eup %1342  ;;  %1362 = vlog2.f32 %v561_v15  ;;  %v557_v30 = vadd.f32 1.0, %v1341_v21  ;;  %v483_v21 = vmax.f32 %v1595_v2, 0.0 }
 0x13a   : > { %v1345_v25 = vpop.eup %1344  ;;  %1364 = vlog2.f32 %v555_v17  ;;  %v565_v46 = vadd.f32 1.0, %v1343_v24 }
 0x13b   : > { %v1347_v26 = vpop.eup %1346  ;;  %v588_v29 = vmul.f32 0.6931472, %v1345_v25  ;;  %1366 = vlog2.f32 %v563_v20 }
 0x13c   : > { %v1349_v31 = vpop.eup %1348  ;;  %1368 = vlog2.f32 %v558_v22  ;;  %v560_v51 = vadd.f32 1.0, %v1347_v26  ;;  %v478_v22 = vmax.f32 %v1602_v13, 0.0 }
 0x13d   : > { %v1351_v33 = vpop.eup %1350  ;;  %v610_v34 = vadd.f32 %v588_v29, %v482_v27  ;;  %1370 = vlog2.f32 %v557_v30  ;;  %v568_v6 = vadd.f32 1.0, %v1349_v31  ;;  %v477_v31 = vmax.f32 %v1608_v23, 0.0 }
 0x13e   : > { %v1353_v36 = vpop.eup %1352  ;;  %v572_v39 = vmul.f32 0.6931472, %v1351_v33  ;;  %1372 = vlog2.f32 %v566_v32  ;;  %v486_v32 = vmax.f32 %v1605_v18, 0.0 }
 0x13f   : > { %v1355_v41 = vpop.eup %1354  ;;  %651 = vrot.lane.b32.xlu1 %v610_v34, %s1471_s13  ;;  %v576_v45 = vmul.f32 0.6931472, %v1353_v36  ;;  %1374 = vlog2.f32 %v565_v46 }
 0x140   : > { %v1357_v49 = vpop.eup %1356  ;;  %v602_v50 = vadd.f32 %v572_v39, %v474_v37  ;;  %v559_v0 = vadd.f32 1.0, %v1355_v41  ;;  %1376 = vlog2.f32 %v560_v51 }
 0x141   : > { %v1359_v52 = vpop.eup %1358  ;;  %v604_v54 = vadd.f32 %v576_v45, %v476_v42  ;;  %v567_v12 = vadd.f32 1.0, %v1357_v49  ;;  %v485_v42 = vmax.f32 %v1612_v28, 0.0  ;;  %v480_v45 = vmax.f32 %v1618_v35, 0.0 }
 0x142   : > { %v1361_v55 = vpop.eup %1360  ;;  %635 = vrot.lane.b32.xlu0 %v602_v50, %s1471_s13  ;;  %v570_v58 = vmul.f32 0.6931472, %v1359_v52  ;;  %1378 = vlog2.f32 %v559_v0  ;;  %v298_v0 = vld [vmem:[%s1669_s16 + $0x48] sm:$0xff] }
 0x143   : > { %v1363_v61 = vpop.eup %1362  ;;  %639 = vrot.lane.b32.xlu1 %v604_v54, %s1471_s13  ;;  %v592_v63 = vmul.f32 0.6931472, %v1361_v55  ;;  %1380 = vlog2.f32 %v568_v6  ;;  %v479_v54 = vmax.f32 %v1626_v53, 0.0  ;;  %v488_v55 = vmax.f32 %v1621_v38, 0.0 }
 0x144   : > { %v1365_v3 = vpop.eup %1364  ;;  %v601_v4 = vadd.f32 %v570_v58, %v473_v57  ;;  %v586_v5 = vmul.f32 0.6931472, %v1363_v61  ;;  %1382 = vlog2.f32 %v567_v12 }
 0x145   : > { %v1367_v7 = vpop.eup %1366  ;;  %v612_v8 = vadd.f32 %v592_v63, %v484_v62  ;;  %v574_v40 = vmul.f32 0.6931472, %v1365_v3  ;;  %v487_v62 = vmax.f32 %v1629_v56, 0.0 }
 0x146   : > { %v1369_v9 = vpop.eup %1368  ;;  %633 = vrot.lane.b32.xlu0 %v601_v4, %s1471_s13  ;;  %v609_v14 = vadd.f32 %v586_v5, %v481_v10  ;;  %v590_v15 = vmul.f32 0.6931472, %v1367_v7  ;;  %v290_v5 = vld [vmem:[%s1669_s16 + $0x8] sm:$0xff]  ;;  %v289_v10 = vld [vmem:[%s1669_s16] sm:$0xff] }
 0x147   : > { %655 = vrot.lane.b32.xlu1 %v612_v8, %s1471_s13  ;;  %v1371_v16 = vpop.eup %1370  ;;  %v603_v17 = vadd.f32 %v574_v40, %v475_v11  ;;  %v580_v19 = vmul.f32 0.6931472, %v1369_v9  ;;  %v292_v9 = vld [vmem:[%s1669_s16 + $0x18] sm:$0xff] }
 0x148   : > { %v1373_v20 = vpop.eup %1372  ;;  %v611_v24 = vadd.f32 %v590_v15, %v483_v21  ;;  %v578_v25 = vmul.f32 0.6931472, %v1371_v16 }
 0x149   : > { %v1375_v26 = vpop.eup %1374  ;;  %v606_v27 = vadd.f32 %v580_v19, %v478_v22  ;;  %v596_v29 = vmul.f32 0.6931472, %v1373_v20  ;;  %v297_v20 = vld [vmem:[%s1669_s16 + $0x40] sm:$0xff] }
 0x14a   : > { %649 = vrot.lane.b32.xlu0 %v609_v14, %s1471_s13  ;;  %v1377_v30 = vpop.eup %1376  ;;  %v605_v33 = vadd.f32 %v578_v25, %v477_v31  ;;  %v594_v34 = vmul.f32 0.6931472, %v1375_v26 }
 0x14b   : > { %637 = vrot.lane.b32.xlu1 %v603_v17, %s1471_s13  ;;  %v614_v37 = vadd.f32 %v596_v29, %v486_v32  ;;  %v584_v39 = vmul.f32 0.6931472, %v1377_v30  ;;  %v300_v17 = vld [vmem:[%s1669_s16 + $0x58] sm:$0xff]  ;;  %v291_v29 = vld [vmem:[%s1669_s16 + $0x10] sm:$0xff] }
 0x14c   : > { %v1379_v36 = vpop.eup %1378  ;;  %v613_v46 = vadd.f32 %v594_v34, %v485_v42  ;;  %v299_v30 = vld [vmem:[%s1669_s16 + $0x50] sm:$0xff] }
 0x14d   : > { %v1381_v41 = vpop.eup %1380  ;;  %v582_v49 = vmul.f32 0.6931472, %v1379_v36  ;;  %v608_v51 = vadd.f32 %v584_v39, %v480_v45  ;;  %v294_v39 = vld [vmem:[%s1669_s16 + $0x28] sm:$0xff] }
 0x14e   : > { %653 = vrot.lane.b32.xlu0 %v611_v24, %s1471_s13  ;;  %v1383_v50 = vpop.eup %1382  ;;  %v600_v52 = vmul.f32 0.6931472, %v1381_v41 }
 0x14f   : > { %643 = vrot.lane.b32.xlu1 %v606_v27, %s1471_s13  ;;  %v607_v57 = vadd.f32 %v582_v49, %v479_v54  ;;  %v598_v58 = vmul.f32 0.6931472, %v1383_v50 }
 0x150   : > { %v616_v61 = vadd.f32 %v600_v52, %v488_v55 }
 0x151   : > { %v615_v63 = vadd.f32 %v598_v58, %v487_v62 }
 0x152   : > { %641 = vrot.lane.b32.xlu0 %v605_v33, %s1471_s13 }
 0x153   : > { %659 = vrot.lane.b32.xlu1 %v614_v37, %s1471_s13 }
 0x156   : > { %657 = vrot.lane.b32.xlu0 %v613_v46, %s1471_s13 }
 0x157   : > { %647 = vrot.lane.b32.xlu1 %v608_v51, %s1471_s13  ;;  %v302_v51 = vld [vmem:[%s1669_s16 + $0x68] sm:$0xff] }
 0x15a   : > { %645 = vrot.lane.b32.xlu0 %v607_v57, %s1471_s13 }
 0x15b   : > { %663 = vrot.lane.b32.xlu1 %v616_v61, %s1471_s13 }
 0x15e   : > { %661 = vrot.lane.b32.xlu0 %v615_v63, %s1471_s13 }
 0x1b1   : > { %v652_v3 = vpop.permute.xlu1 %651 }
 0x1b2   : > { %v690_v4 = vmul.f32 %v652_v3, %v298_v0  ;;  %v296_v0 = vld [vmem:[%s1669_s16 + $0x38] sm:$0xff] }
 0x1b4   : > { %v1674_v6 = vadd.f32 %v690_v4, %v1573_v44  ;;  %v636_v7 = vpop.permute.xlu0 %635 }
 0x1b5   : > { %v682_v8 = vmul.f32 %v636_v7, %v290_v5  ;;  %v640_v40 = vpop.permute.xlu1 %639 }
 0x1b6   : > { %v741_v11 = vsel %vm713_vm0, %v1674_v6, -inf  ;;  %v684_v15 = vmul.f32 %v640_v40, %v292_v9  ;;  %v304_v9 = vld [vmem:[%s1669_s16 + $0x78] sm:$0xff] }
 0x1b7   : > { %v1681_v12 = vadd.f32 %v682_v8, %v1570_v43  ;;  %742 = vmax.xlane.f32.xlu0 %v741_v11  ;;  %v303_v11 = vld [vmem:[%s1669_s16 + $0x70] sm:$0xff] }
 0x1b8   : > { %v634_v14 = vpop.permute.xlu0 %633  ;;  %v1691_v43 = vadd.f32 %v684_v15, %v1586_v59 }
 0x1b9   : > { %v681_v16 = vmul.f32 %v634_v14, %v289_v10  ;;  %v717_v44 = vsel %vm713_vm0, %v1681_v12, -inf  ;;  %v656_v19 = vpop.permute.xlu1 %655 }
 0x1ba   : > { %718 = vmax.xlane.f32.xlu1 %v717_v44  ;;  %v692_v22 = vmul.f32 %v656_v19, %v300_v17  ;;  %v723_v34 = vsel %vm713_vm0, %v1691_v43, -inf }
 0x1bb   : > { %v1688_v21 = vadd.f32 %v681_v16, %v1576_v47 }
 0x1bc   : > { %v650_v24 = vpop.permute.xlu0 %649  ;;  %v1701_v47 = vadd.f32 %v692_v22, %v1589_v60 }
 0x1bd   : > { %v689_v25 = vmul.f32 %v650_v24, %v297_v20  ;;  %v714_v26 = vsel %vm713_vm0, %v1688_v21, -inf  ;;  %v638_v27 = vpop.permute.xlu1 %637 }
 0x1be   : > { %715 = vmax.xlane.f32.xlu0 %v714_v26  ;;  %v683_v33 = vmul.f32 %v638_v27, %v291_v29  ;;  %v747_v42 = vsel %vm713_vm0, %v1701_v47, -inf }
 0x1bf   : > { %v1698_v31 = vadd.f32 %v689_v25, %v1579_v48  ;;  %v293_v48 = vld [vmem:[%s1669_s16 + $0x20] sm:$0xff] }
 0x1c0   : > { %v654_v32 = vpop.permute.xlu0 %653  ;;  %v1715_v45 = vadd.f32 %v683_v33, %v1592_v1 }
 0x1c1   : > { %v691_v59 = vmul.f32 %v654_v32, %v299_v30  ;;  %v738_v36 = vsel %vm713_vm0, %v1698_v31, -inf  ;;  %v644_v37 = vpop.permute.xlu1 %643 }
 0x1c2   : > { %724 = vmax.xlane.f32.xlu0 %v723_v34  ;;  %739 = vmax.xlane.f32.xlu1 %v738_v36  ;;  %v686_v46 = vmul.f32 %v644_v37, %v294_v39  ;;  %v720_v61 = vsel %vm713_vm0, %v1715_v45, -inf }
 0x1c3   : > { %v1710_v41 = vadd.f32 %v691_v59, %v1595_v2  ;;  %v301_v2 = vld [vmem:[%s1669_s16 + $0x60] sm:$0xff] }
 0x1c4   : > { %v642_v60 = vpop.permute.xlu0 %641  ;;  %v1725_v1 = vadd.f32 %v686_v46, %v1602_v13 }
 0x1c5   : > { %v685_v49 = vmul.f32 %v642_v60, %v293_v48  ;;  %v744_v50 = vsel %vm713_vm0, %v1710_v41, -inf  ;;  %v660_v52 = vpop.permute.xlu1 %659 }
 0x1c6   : > { %748 = vmax.xlane.f32.xlu0 %v747_v42  ;;  %745 = vmax.xlane.f32.xlu1 %v744_v50  ;;  %v694_v55 = vmul.f32 %v660_v52, %v302_v51  ;;  %v729_v8 = vsel %vm713_vm0, %v1725_v1, -inf }
 0x1c7   : > { %v1722_v54 = vadd.f32 %v685_v49, %v1608_v23  ;;  %v295_v23 = vld [vmem:[%s1669_s16 + $0x30] sm:$0xff] }
 0x1c8   : > { %v658_v57 = vpop.permute.xlu0 %657  ;;  %v1737_v13 = vadd.f32 %v694_v55, %v1605_v18 }
 0x1c9   : > { %v693_v58 = vmul.f32 %v658_v57, %v301_v2  ;;  %v726_v62 = vsel %vm713_vm0, %v1722_v54, -inf  ;;  %v648_v63 = vpop.permute.xlu1 %647 }
 0x1ca   : > { %721 = vmax.xlane.f32.xlu0 %v720_v61  ;;  %727 = vmax.xlane.f32.xlu1 %v726_v62  ;;  %v688_v5 = vmul.f32 %v648_v63, %v296_v0  ;;  %v753_v18 = vsel %vm713_vm0, %v1737_v13, -inf }
 0x1cb   : > { %v1734_v3 = vadd.f32 %v693_v58, %v1612_v28 }
 0x1cc   : > { %v646_v4 = vpop.permute.xlu0 %645  ;;  %v1751_v15 = vadd.f32 %v688_v5, %v1618_v35 }
 0x1cd   : > { %v687_v7 = vmul.f32 %v646_v4, %v295_v23  ;;  %v750_v40 = vsel %vm713_vm0, %v1734_v3, -inf  ;;  %v664_v10 = vpop.permute.xlu1 %663 }
 0x1ce   : > { %730 = vmax.xlane.f32.xlu0 %v729_v8  ;;  %751 = vmax.xlane.f32.xlu1 %v750_v40  ;;  %v696_v16 = vmul.f32 %v664_v10, %v304_v9  ;;  %v735_v20 = vsel %vm713_vm0, %v1751_v15, -inf }
 0x1cf   : > { %v1746_v28 = vadd.f32 %v687_v7, %v1626_v53 }
 0x1d0   : > { %v662_v14 = vpop.permute.xlu0 %661  ;;  %v1759_v53 = vadd.f32 %v696_v16, %v1621_v38 }
 0x1d1   : > { %v695_v44 = vmul.f32 %v662_v14, %v303_v11  ;;  %v732_v17 = vsel %vm713_vm0, %v1746_v28, -inf }
 0x1d2   : > { %754 = vmax.xlane.f32.xlu0 %v753_v18  ;;  %733 = vmax.xlane.f32.xlu1 %v732_v17  ;;  %v759_v22 = vsel %vm713_vm0, %v1759_v53, -inf }
 0x1d3   : > { %v1756_v19 = vadd.f32 %v695_v44, %v1629_v56 }
 0x1d5   : > { %v756_v35 = vsel %vm713_vm0, %v1756_v19, -inf }
 0x1d6   : > { %736 = vmax.xlane.f32.xlu0 %v735_v20  ;;  %757 = vmax.xlane.f32.xlu1 %v756_v35 }
 0x1da   : > { %760 = vmax.xlane.f32.xlu0 %v759_v22 }
 0x244   : > { %v743_v24 = vpop.xlane.xlu0 %742 }
 0x245   : > { %vm771_vm2 = vcmp.ge.f32.partialorder %v1674_v6, %v743_v24 }
 0x246   : > { %v787_v27 = vsel %vm771_vm2, -1e+30, %v1674_v6 }
 0x247   : > { %v719_v25 = vpop.xlane.xlu1 %718  ;;  %v821_v30 = vsel %vm713_vm0, %v787_v27, -inf }
 0x248   : > { %vm763_vm1 = vcmp.ge.f32.partialorder %v1681_v12, %v719_v25 }
 0x249   : > { %v779_v38 = vsel %vm763_vm1, -1e+30, %v1681_v12 }
 0x24a   : > { %v797_v56 = vsel %vm713_vm0, %v779_v38, -inf }
 0x24b   : > { %798 = vmax.xlane.f32.xlu0 %v797_v56  ;;  %v716_v26 = vpop.xlane.xlu0 %715 }
 0x24c   : > { %vm762_vm3 = vcmp.ge.f32.partialorder %v1688_v21, %v716_v26 }
 0x24d   : > { %v778_v29 = vsel %vm762_vm3, -1e+30, %v1688_v21 }
 0x24e   : > { %v794_v32 = vsel %vm713_vm0, %v778_v29, -inf }
 0x24f   : > { %v740_v33 = vpop.xlane.xlu1 %739  ;;  %822 = vmax.xlane.f32.xlu0 %v821_v30  ;;  %795 = vmax.xlane.f32.xlu1 %v794_v32  ;;  %v725_v59 = vpop.xlane.xlu0 %724 }
 0x250   : > { %vm770_vm4 = vcmp.ge.f32.partialorder %v1698_v31, %v740_v33  ;;  %vm765_vm5 = vcmp.ge.f32.partialorder %v1691_v43, %v725_v59 }
 0x251   : > { %v786_v34 = vsel %vm770_vm4, -1e+30, %v1698_v31  ;;  %v781_v36 = vsel %vm765_vm5, -1e+30, %v1691_v43 }
 0x252   : > { %v818_v37 = vsel %vm713_vm0, %v786_v34, -inf  ;;  %v803_v39 = vsel %vm713_vm0, %v781_v36, -inf }
 0x253   : > { %v746_v48 = vpop.xlane.xlu1 %745  ;;  %819 = vmax.xlane.f32.xlu1 %v818_v37  ;;  %804 = vmax.xlane.f32.xlu0 %v803_v39  ;;  %v749_v60 = vpop.xlane.xlu0 %748 }
 0x254   : > { %vm773_vm6 = vcmp.ge.f32.partialorder %v1701_v47, %v749_v60  ;;  %vm772_vm7 = vcmp.ge.f32.partialorder %v1710_v41, %v746_v48 }
 0x255   : > { %v789_v42 = vsel %vm773_vm6, -1e+30, %v1701_v47  ;;  %v788_v57 = vsel %vm772_vm7, -1e+30, %v1710_v41 }
 0x256   : > { %v827_v46 = vsel %vm713_vm0, %v789_v42, -inf  ;;  %v824_v61 = vsel %vm713_vm0, %v788_v57, -inf }
 0x257   : > { %v728_v49 = vpop.xlane.xlu1 %727  ;;  %828 = vmax.xlane.f32.xlu0 %v827_v46  ;;  %v722_v50 = vpop.xlane.xlu0 %721 }
 0x258   : > { %vm764_vm8 = vcmp.ge.f32.partialorder %v1715_v45, %v722_v50  ;;  %vm766_vm9 = vcmp.ge.f32.partialorder %v1722_v54, %v728_v49 }
 0x259   : > { %v780_v51 = vsel %vm764_vm8, -1e+30, %v1715_v45  ;;  %v782_v23 = vsel %vm766_vm9, -1e+30, %v1722_v54 }
 0x25a   : > { %v800_v52 = vsel %vm713_vm0, %v780_v51, -inf  ;;  %v806_v5 = vsel %vm713_vm0, %v782_v23, -inf }
 0x25b   : > { %v752_v2 = vpop.xlane.xlu1 %751  ;;  %801 = vmax.xlane.f32.xlu1 %v800_v52  ;;  %v731_v55 = vpop.xlane.xlu0 %730 }
 0x25c   : > { %vm767_vm10 = vcmp.ge.f32.partialorder %v1725_v1, %v731_v55  ;;  %vm774_vm11 = vcmp.ge.f32.partialorder %v1734_v3, %v752_v2 }
 0x25d   : > { %v783_v58 = vsel %vm767_vm10, -1e+30, %v1725_v1  ;;  %v790_v40 = vsel %vm774_vm11, -1e+30, %v1734_v3 }
 0x25e   : > { %v809_v62 = vsel %vm713_vm0, %v783_v58, -inf  ;;  %v830_v11 = vsel %vm713_vm0, %v790_v40, -inf }
 0x25f   : > { %v734_v63 = vpop.xlane.xlu1 %733  ;;  %825 = vmax.xlane.f32.xlu1 %v824_v61  ;;  %810 = vmax.xlane.f32.xlu0 %v809_v62  ;;  %v755_v0 = vpop.xlane.xlu0 %754 }
 0x260   : > { %vm775_vm12 = vcmp.ge.f32.partialorder %v1737_v13, %v755_v0  ;;  %vm768_vm13 = vcmp.ge.f32.partialorder %v1746_v28, %v734_v63 }
 0x261   : > { %v791_v4 = vsel %vm775_vm12, -1e+30, %v1737_v13  ;;  %v784_v16 = vsel %vm768_vm13, -1e+30, %v1746_v28 }
 0x262   : > { %v833_v7 = vsel %vm713_vm0, %v791_v4, -inf  ;;  %v812_v17 = vsel %vm713_vm0, %v784_v16, -inf }
 0x263   : > { %807 = vmax.xlane.f32.xlu1 %v806_v5  ;;  %834 = vmax.xlane.f32.xlu0 %v833_v7  ;;  %v737_v8 = vpop.xlane.xlu0 %736  ;;  %v758_v9 = vpop.xlane.xlu1 %757 }
 0x264   : > { %vm769_vm14 = vcmp.ge.f32.partialorder %v1751_v15, %v737_v8  ;;  %vm776_vm15 = vcmp.ge.f32.partialorder %v1756_v19, %v758_v9 }
 0x265   : > { %v785_v10 = vsel %vm769_vm14, -1e+30, %v1751_v15  ;;  %v792_v35 = vsel %vm776_vm15, -1e+30, %v1756_v19 }
 0x266   : > { %v815_v14 = vsel %vm713_vm0, %v785_v10, -inf  ;;  %v836_v22 = vsel %vm713_vm0, %v792_v35, -inf }
 0x267   : > { %831 = vmax.xlane.f32.xlu1 %v830_v11  ;;  %816 = vmax.xlane.f32.xlu0 %v815_v14  ;;  %v761_v18 = vpop.xlane.xlu0 %760 }
 0x268   : > { %vm777_vm1 = vcmp.ge.f32.partialorder %v1759_v53, %v761_v18 }
 0x269   : > { %v793_v44 = vsel %vm777_vm1, -1e+30, %v1759_v53 }
 0x26a   : > { %v839_v20 = vsel %vm713_vm0, %v793_v44, -inf }
 0x26b   : > { %813 = vmax.xlane.f32.xlu1 %v812_v17  ;;  %840 = vmax.xlane.f32.xlu0 %v839_v20 }
 0x26f   : > { %837 = vmax.xlane.f32.xlu1 %v836_v22 }
 0x2d8   : > { %v799_v24 = vpop.xlane.xlu0 %798 }
 0x2d9   : > { %vm843_vm2 = vcmp.ge.f32.partialorder %v1681_v12, %v799_v24 }
 0x2da   : > { %v1817_v25 = vsel %vm843_vm2, %v1681_v12, -1e+30 }
 0x2db   : > { %v877_v38 = vsel %vm713_vm0, %v1817_v25, -inf }
 0x2dc   : > { %v796_v56 = vpop.xlane.xlu1 %795  ;;  %878 = vmax.xlane.f32.xlu0 %v877_v38  ;;  %v823_v26 = vpop.xlane.xlu0 %822 }
 0x2dd   : > { %vm842_vm3 = vcmp.ge.f32.partialorder %v1688_v21, %v796_v56  ;;  %vm851_vm4 = vcmp.ge.f32.partialorder %v1674_v6, %v823_v26 }
 0x2de   : > { %v1824_v27 = vsel %vm842_vm3, %v1688_v21, -1e+30  ;;  %v1827_v29 = vsel %vm851_vm4, %v1674_v6, -1e+30 }
 0x2df   : > { %v874_v12 = vsel %vm713_vm0, %v1824_v27, -inf  ;;  %v901_v30 = vsel %vm713_vm0, %v1827_v29, -inf }
 0x2e0   : > { %v820_v32 = vpop.xlane.xlu1 %819  ;;  %875 = vmax.xlane.f32.xlu1 %v874_v12  ;;  %902 = vmax.xlane.f32.xlu0 %v901_v30  ;;  %v805_v33 = vpop.xlane.xlu0 %804 }
 0x2e1   : > { %vm850_vm5 = vcmp.ge.f32.partialorder %v1698_v31, %v820_v32  ;;  %vm845_vm6 = vcmp.ge.f32.partialorder %v1691_v43, %v805_v33 }
 0x2e2   : > { %v1836_v21 = vsel %vm850_vm5, %v1698_v31, -1e+30  ;;  %v1839_v6 = vsel %vm845_vm6, %v1691_v43, -1e+30 }
 0x2e3   : > { %v898_v59 = vsel %vm713_vm0, %v1836_v21, -inf  ;;  %v883_v34 = vsel %vm713_vm0, %v1839_v6, -inf }
 0x2e4   : > { %899 = vmax.xlane.f32.xlu1 %v898_v59  ;;  %884 = vmax.xlane.f32.xlu0 %v883_v34  ;;  %v829_v36 = vpop.xlane.xlu0 %828 }
 0x2e5   : > { %vm853_vm7 = vcmp.ge.f32.partialorder %v1701_v47, %v829_v36 }
 0x2e6   : > { %v1847_v37 = vsel %vm853_vm7, %v1701_v47, -1e+30 }
 0x2e7   : > { %v907_v31 = vsel %vm713_vm0, %v1847_v37, -inf }
 0x2e8   : > { %v802_v39 = vpop.xlane.xlu1 %801  ;;  %908 = vmax.xlane.f32.xlu0 %v907_v31 }
 0x2e9   : > { %vm844_vm8 = vcmp.ge.f32.partialorder %v1715_v45, %v802_v39 }
 0x2ea   : > { %v1853_v43 = vsel %vm844_vm8, %v1715_v45, -1e+30 }
 0x2eb   : > { %v880_v48 = vsel %vm713_vm0, %v1853_v43, -inf }
 0x2ec   : > { %881 = vmax.xlane.f32.xlu1 %v880_v48  ;;  %v826_v60 = vpop.xlane.xlu1 %825  ;;  %v811_v42 = vpop.xlane.xlu0 %810 }
 0x2ed   : > { %vm852_vm9 = vcmp.ge.f32.partialorder %v1710_v41, %v826_v60  ;;  %vm847_vm10 = vcmp.ge.f32.partialorder %v1725_v1, %v811_v42 }
 0x2ee   : > { %v1860_v47 = vsel %vm852_vm9, %v1710_v41, -1e+30  ;;  %v1863_v46 = vsel %vm847_vm10, %v1725_v1, -1e+30 }
 0x2ef   : > { %v904_v45 = vsel %vm713_vm0, %v1860_v47, -inf  ;;  %v889_v49 = vsel %vm713_vm0, %v1863_v46, -inf }
 0x2f0   : > { %905 = vmax.xlane.f32.xlu1 %v904_v45  ;;  %v808_v50 = vpop.xlane.xlu1 %807  ;;  %890 = vmax.xlane.f32.xlu0 %v889_v49  ;;  %v835_v51 = vpop.xlane.xlu0 %834 }
 0x2f1   : > { %vm846_vm11 = vcmp.ge.f32.partialorder %v1722_v54, %v808_v50  ;;  %vm855_vm12 = vcmp.ge.f32.partialorder %v1737_v13, %v835_v51 }
 0x2f2   : > { %v1872_v41 = vsel %vm846_vm11, %v1722_v54, -1e+30  ;;  %v1875_v1 = vsel %vm855_vm12, %v1737_v13, -1e+30 }
 0x2f3   : > { %v886_v52 = vsel %vm713_vm0, %v1872_v41, -inf  ;;  %v913_v2 = vsel %vm713_vm0, %v1875_v1, -inf }
 0x2f4   : > { %887 = vmax.xlane.f32.xlu1 %v886_v52  ;;  %v832_v55 = vpop.xlane.xlu1 %831  ;;  %914 = vmax.xlane.f32.xlu0 %v913_v2  ;;  %v817_v57 = vpop.xlane.xlu0 %816 }
 0x2f5   : > { %vm854_vm13 = vcmp.ge.f32.partialorder %v1734_v3, %v832_v55  ;;  %vm849_vm14 = vcmp.ge.f32.partialorder %v1751_v15, %v817_v57 }
 0x2f6   : > { %v1884_v54 = vsel %vm854_vm13, %v1734_v3, -1e+30  ;;  %v1887_v13 = vsel %vm849_vm14, %v1751_v15, -1e+30 }
 0x2f7   : > { %v910_v58 = vsel %vm713_vm0, %v1884_v54, -inf  ;;  %v895_v61 = vsel %vm713_vm0, %v1887_v13, -inf }
 0x2f8   : > { %911 = vmax.xlane.f32.xlu1 %v910_v58  ;;  %v814_v62 = vpop.xlane.xlu1 %813  ;;  %896 = vmax.xlane.f32.xlu0 %v895_v61  ;;  %v841_v63 = vpop.xlane.xlu0 %840 }
 0x2f9   : > { %vm848_vm15 = vcmp.ge.f32.partialorder %v1746_v28, %v814_v62  ;;  %vm857_vm1 = vcmp.ge.f32.partialorder %v1759_v53, %v841_v63 }
 0x2fa   : > { %v1896_v3 = vsel %vm848_vm15, %v1746_v28, -1e+30  ;;  %v1899_v15 = vsel %vm857_vm1, %v1759_v53, -1e+30 }
 0x2fb   : > { %v892_v0 = vsel %vm713_vm0, %v1896_v3, -inf  ;;  %v919_v23 = vsel %vm713_vm0, %v1899_v15, -inf }
 0x2fc   : > { %893 = vmax.xlane.f32.xlu1 %v892_v0  ;;  %v838_v4 = vpop.xlane.xlu1 %837  ;;  %920 = vmax.xlane.f32.xlu0 %v919_v23 }
 0x2fd   : > { %vm856_vm2 = vcmp.ge.f32.partialorder %v1756_v19, %v838_v4 }
 0x2fe   : > { %v1907_v5 = vsel %vm856_vm2, %v1756_v19, -1e+30 }
 0x2ff   : > { %v916_v28 = vsel %vm713_vm0, %v1907_v5, -inf }
 0x300   : > { %917 = vmax.xlane.f32.xlu1 %v916_v28 }
 0x369   : > { %v879_v53 = vpop.xlane.xlu0 %878 }
 0x36a   : > { %v923_v7 = vsub.f32 %v1817_v25, %v879_v53 }
 0x36c   : > { %v940_v8 = vmul.f32 1.442695, %v923_v7 }
 0x36d   : > { %v876_v40 = vpop.xlane.xlu1 %875  ;;  %v903_v9 = vpop.xlane.xlu0 %902 }
 0x36e   : > { %1384 = vpow2.f32 %v940_v8  ;;  %v922_v10 = vsub.f32 %v1824_v27, %v876_v40  ;;  %v931_v11 = vsub.f32 %v1827_v29, %v903_v9 }
 0x370   : > { %v938_v14 = vmul.f32 1.442695, %v922_v10  ;;  %v956_v18 = vmul.f32 1.442695, %v931_v11 }
 0x371   : > { %v900_v16 = vpop.xlane.xlu1 %899  ;;  %v885_v19 = vpop.xlane.xlu0 %884 }
 0x372   : > { %1386 = vpow2.f32 %v938_v14  ;;  %v930_v44 = vsub.f32 %v1836_v21, %v900_v16  ;;  %v925_v17 = vsub.f32 %v1839_v6, %v885_v19 }
 0x373   : > { %1388 = vpow2.f32 %v956_v18 }
 0x374   : > { %v954_v20 = vmul.f32 1.442695, %v930_v44  ;;  %v944_v35 = vmul.f32 1.442695, %v925_v17 }
 0x375   : > { %v909_v22 = vpop.xlane.xlu0 %908 }
 0x376   : > { %1390 = vpow2.f32 %v954_v20  ;;  %v933_v24 = vsub.f32 %v1847_v37, %v909_v22 }
 0x377   : > { %1392 = vpow2.f32 %v944_v35 }
 0x378   : > { %v1917_v25 = vpop.eup %1384  ;;  %v960_v38 = vmul.f32 1.442695, %v933_v24 }
 0x379   : > { %v882_v56 = vpop.xlane.xlu1 %881  ;;  %v973_v26 = vsel %vm713_vm0, %v1917_v25, 0.0 }
 0x37a   : > { %1394 = vpow2.f32 %v960_v38  ;;  %v924_v27 = vsub.f32 %v1853_v43, %v882_v56  ;;  %974 = vadd.xlane.f32.xlu0 %v973_v26 }
 0x37c   : > { %v1922_v29 = vpop.eup %1386  ;;  %v942_v12 = vmul.f32 1.442695, %v924_v27 }
 0x37d   : > { %v1924_v30 = vpop.eup %1388  ;;  %v906_v32 = vpop.xlane.xlu1 %905  ;;  %v970_v21 = vsel %vm713_vm0, %v1922_v29, 0.0 }
 0x37e   : > { %v891_v33 = vpop.xlane.xlu0 %890  ;;  %1396 = vpow2.f32 %v942_v12  ;;  %v932_v6 = vsub.f32 %v1860_v47, %v906_v32  ;;  %971 = vadd.xlane.f32.xlu1 %v970_v21  ;;  %v997_v34 = vsel %vm713_vm0, %v1924_v30, 0.0 }
 0x37f   : > { %v927_v59 = vsub.f32 %v1863_v46, %v891_v33  ;;  %998 = vadd.xlane.f32.xlu0 %v997_v34 }
 0x380   : > { %v1932_v36 = vpop.eup %1390  ;;  %v958_v37 = vmul.f32 1.442695, %v932_v6 }
 0x381   : > { %v948_v31 = vmul.f32 1.442695, %v927_v59  ;;  %v1934_v39 = vpop.eup %1392  ;;  %v888_v43 = vpop.xlane.xlu1 %887  ;;  %v994_v60 = vsel %vm713_vm0, %v1932_v36, 0.0 }
 0x382   : > { %v915_v48 = vpop.xlane.xlu0 %914  ;;  %1398 = vpow2.f32 %v958_v37  ;;  %v926_v42 = vsub.f32 %v1872_v41, %v888_v43  ;;  %995 = vadd.xlane.f32.xlu1 %v994_v60  ;;  %v979_v46 = vsel %vm713_vm0, %v1934_v39, 0.0 }
 0x383   : > { %v935_v47 = vsub.f32 %v1875_v1, %v915_v48  ;;  %1400 = vpow2.f32 %v948_v31  ;;  %980 = vadd.xlane.f32.xlu0 %v979_v46 }
 0x384   : > { %v1942_v45 = vpop.eup %1394  ;;  %v946_v49 = vmul.f32 1.442695, %v926_v42 }
 0x385   : > { %v964_v50 = vmul.f32 1.442695, %v935_v47  ;;  %v912_v51 = vpop.xlane.xlu1 %911  ;;  %v1003_v2 = vsel %vm713_vm0, %v1942_v45, 0.0 }
 0x386   : > { %v897_v52 = vpop.xlane.xlu0 %896  ;;  %1402 = vpow2.f32 %v946_v49  ;;  %v934_v41 = vsub.f32 %v1884_v54, %v912_v51 }
 0x387   : > { %v929_v1 = vsub.f32 %v1887_v13, %v897_v52  ;;  %1404 = vpow2.f32 %v964_v50  ;;  %1004 = vadd.xlane.f32.xlu0 %v1003_v2 }
 0x388   : > { %v1948_v55 = vpop.eup %1396  ;;  %v962_v57 = vmul.f32 1.442695, %v934_v41 }
 0x389   : > { %v952_v58 = vmul.f32 1.442695, %v929_v1  ;;  %v894_v61 = vpop.xlane.xlu1 %893  ;;  %v976_v63 = vsel %vm713_vm0, %v1948_v55, 0.0 }
 0x38a   : > { %v921_v62 = vpop.xlane.xlu0 %920  ;;  %1406 = vpow2.f32 %v962_v57  ;;  %v928_v0 = vsub.f32 %v1896_v3, %v894_v61  ;;  %977 = vadd.xlane.f32.xlu1 %v976_v63 }
 0x38b   : > { %v937_v23 = vsub.f32 %v1899_v15, %v921_v62  ;;  %1408 = vpow2.f32 %v952_v58 }
 0x38c   : > { %v1954_v54 = vpop.eup %1398  ;;  %v950_v13 = vmul.f32 1.442695, %v928_v0 }
 0x38d   : > { %v968_v4 = vmul.f32 1.442695, %v937_v23  ;;  %v1956_v28 = vpop.eup %1400  ;;  %v918_v53 = vpop.xlane.xlu1 %917  ;;  %v1000_v7 = vsel %vm713_vm0, %v1954_v54, 0.0 }
 0x38e   : > { %1410 = vpow2.f32 %v950_v13  ;;  %v936_v8 = vsub.f32 %v1907_v5, %v918_v53  ;;  %1001 = vadd.xlane.f32.xlu1 %v1000_v7  ;;  %v985_v3 = vsel %vm713_vm0, %v1956_v28, 0.0 }
 0x38f   : > { %1412 = vpow2.f32 %v968_v4  ;;  %986 = vadd.xlane.f32.xlu0 %v985_v3 }
 0x390   : > { %v1963_v15 = vpop.eup %1402  ;;  %v966_v40 = vmul.f32 1.442695, %v936_v8 }
 0x391   : > { %v1965_v9 = vpop.eup %1404  ;;  %v982_v10 = vsel %vm713_vm0, %v1963_v15, 0.0 }
 0x392   : > { %1414 = vpow2.f32 %v966_v40  ;;  %983 = vadd.xlane.f32.xlu1 %v982_v10  ;;  %v1009_v11 = vsel %vm713_vm0, %v1965_v9, 0.0 }
 0x393   : > { %1010 = vadd.xlane.f32.xlu0 %v1009_v11 }
 0x394   : > { %v1971_v5 = vpop.eup %1406 }
 0x395   : > { %v1973_v14 = vpop.eup %1408  ;;  %v1006_v18 = vsel %vm713_vm0, %v1971_v5, 0.0 }
 0x396   : > { %1007 = vadd.xlane.f32.xlu1 %v1006_v18  ;;  %v991_v16 = vsel %vm713_vm0, %v1973_v14, 0.0 }
 0x397   : > { %992 = vadd.xlane.f32.xlu0 %v991_v16 }
 0x398   : > { %v1979_v19 = vpop.eup %1410 }
 0x399   : > { %v1981_v44 = vpop.eup %1412  ;;  %v988_v17 = vsel %vm713_vm0, %v1979_v19, 0.0 }
 0x39a   : > { %989 = vadd.xlane.f32.xlu1 %v988_v17  ;;  %v1015_v20 = vsel %vm713_vm0, %v1981_v44, 0.0 }
 0x39b   : > { %1016 = vadd.xlane.f32.xlu0 %v1015_v20 }
 0x39c   : > { %v1987_v35 = vpop.eup %1414 }
 0x39d   : > { %v1012_v22 = vsel %vm713_vm0, %v1987_v35, 0.0 }
 0x39e   : > { %1013 = vadd.xlane.f32.xlu1 %v1012_v22 }
 0x407   : > { %v975_v24 = vpop.xlane.xlu0 %974 }
 0x408   : > { %1416 = vrcp.f32 %v975_v24 }
 0x40b   : > { %v972_v38 = vpop.xlane.xlu1 %971 }
 0x40c   : > { %1418 = vrcp.f32 %v972_v38  ;;  %v999_v56 = vpop.xlane.xlu0 %998 }
 0x40d   : > { %1420 = vrcp.f32 %v999_v56 }
 0x40f   : > { %v996_v26 = vpop.xlane.xlu1 %995 }
 0x410   : > { %1422 = vrcp.f32 %v996_v26  ;;  %v981_v27 = vpop.xlane.xlu0 %980 }
 0x411   : > { %1424 = vrcp.f32 %v981_v27 }
 0x412   : > { %v1417_v12 = vpop.eup %1416 }
 0x413   : > { %v1021_v32 = vmul.f32 %v1417_v12, %v1917_v25 }
 0x414   : > { %v1005_v33 = vpop.xlane.xlu0 %1004 }
 0x415   : > { %1051 = vst.msk [vmem:[%s1995_s19 + $0x8] sm:$0xff] %vm713_vm0, %v1021_v32  ;;  %1426 = vrcp.f32 %v1005_v33 }
 0x416   : > { %v1419_v21 = vpop.eup %1418 }
 0x417   : > { %v1421_v6 = vpop.eup %1420  ;;  %v1019_v59 = vmul.f32 %v1419_v21, %v1922_v29  ;;  %v978_v34 = vpop.xlane.xlu1 %977 }
 0x418   : > { %v1037_v37 = vmul.f32 %v1421_v6, %v1924_v30  ;;  %1428 = vrcp.f32 %v978_v34 }
 0x419   : > { %1050 = vst.msk [vmem:[%s1995_s19] sm:$0xff] %vm713_vm0, %v1019_v59 }
 0x41a   : > { %v1423_v31 = vpop.eup %1422  ;;  %1059 = vst.msk [vmem:[%s1995_s19 + $0x48] sm:$0xff] %vm713_vm0, %v1037_v37 }
 0x41b   : > { %v1425_v25 = vpop.eup %1424  ;;  %v1035_v43 = vmul.f32 %v1423_v31, %v1932_v36  ;;  %v1002_v48 = vpop.xlane.xlu1 %1001 }
 0x41c   : > { %v1025_v60 = vmul.f32 %v1425_v25, %v1934_v39  ;;  %1430 = vrcp.f32 %v1002_v48  ;;  %v987_v42 = vpop.xlane.xlu0 %986 }
 0x41d   : > { %1058 = vst.msk [vmem:[%s1995_s19 + $0x40] sm:$0xff] %vm713_vm0, %v1035_v43  ;;  %1432 = vrcp.f32 %v987_v42 }
 0x41e   : > { %1053 = vst.msk [vmem:[%s1995_s19 + $0x18] sm:$0xff] %vm713_vm0, %v1025_v60 }
 0x41f   : > { %v1427_v29 = vpop.eup %1426  ;;  %v984_v30 = vpop.xlane.xlu1 %983 }
 0x420   : > { %v1041_v47 = vmul.f32 %v1427_v29, %v1942_v45  ;;  %1434 = vrcp.f32 %v984_v30  ;;  %v1011_v46 = vpop.xlane.xlu0 %1010 }
 0x421   : > { %1436 = vrcp.f32 %v1011_v46 }
 0x422   : > { %v1429_v36 = vpop.eup %1428  ;;  %1061 = vst.msk [vmem:[%s1995_s19 + $0x58] sm:$0xff] %vm713_vm0, %v1041_v47 }
 0x423   : > { %v1023_v39 = vmul.f32 %v1429_v36, %v1948_v55  ;;  %v1008_v49 = vpop.xlane.xlu1 %1007 }
 0x424   : > { %1438 = vrcp.f32 %v1008_v49  ;;  %v993_v50 = vpop.xlane.xlu0 %992 }
 0x425   : > { %1052 = vst.msk [vmem:[%s1995_s19 + $0x10] sm:$0xff] %vm713_vm0, %v1023_v39  ;;  %1440 = vrcp.f32 %v993_v50 }
 0x426   : > { %v1431_v51 = vpop.eup %1430 }
 0x427   : > { %v1433_v52 = vpop.eup %1432  ;;  %v1039_v45 = vmul.f32 %v1431_v51, %v1954_v54  ;;  %v990_v2 = vpop.xlane.xlu1 %989 }
 0x428   : > { %v1029_v41 = vmul.f32 %v1433_v52, %v1956_v28  ;;  %1442 = vrcp.f32 %v990_v2  ;;  %v1017_v1 = vpop.xlane.xlu0 %1016 }
 0x429   : > { %1060 = vst.msk [vmem:[%s1995_s19 + $0x50] sm:$0xff] %vm713_vm0, %v1039_v45  ;;  %1444 = vrcp.f32 %v1017_v1 }
 0x42a   : > { %v1435_v55 = vpop.eup %1434  ;;  %1055 = vst.msk [vmem:[%s1995_s19 + $0x28] sm:$0xff] %vm713_vm0, %v1029_v41 }
 0x42b   : > { %v1437_v57 = vpop.eup %1436  ;;  %v1027_v58 = vmul.f32 %v1435_v55, %v1963_v15  ;;  %v1014_v61 = vpop.xlane.xlu1 %1013 }
 0x42c   : > { %v1045_v62 = vmul.f32 %v1437_v57, %v1965_v9  ;;  %1446 = vrcp.f32 %v1014_v61 }
 0x42d   : > { %1054 = vst.msk [vmem:[%s1995_s19 + $0x20] sm:$0xff] %vm713_vm0, %v1027_v58 }
 0x42e   : > { %v1439_v63 = vpop.eup %1438  ;;  %1063 = vst.msk [vmem:[%s1995_s19 + $0x68] sm:$0xff] %vm713_vm0, %v1045_v62 }
 0x42f   : > { %v1441_v0 = vpop.eup %1440  ;;  %v1043_v23 = vmul.f32 %v1439_v63, %v1971_v5 }
 0x430   : > { %v1033_v54 = vmul.f32 %v1441_v0, %v1973_v14 }
 0x431   : > { %1062 = vst.msk [vmem:[%s1995_s19 + $0x60] sm:$0xff] %vm713_vm0, %v1043_v23 }
 0x432   : > { %v1443_v13 = vpop.eup %1442  ;;  %1057 = vst.msk [vmem:[%s1995_s19 + $0x38] sm:$0xff] %vm713_vm0, %v1033_v54 }
 0x433   : > { %v1445_v4 = vpop.eup %1444  ;;  %v1031_v28 = vmul.f32 %v1443_v13, %v1979_v19 }
 0x434   : > { %v1049_v53 = vmul.f32 %v1445_v4, %v1981_v44 }
 0x435   : > { %1056 = vst.msk [vmem:[%s1995_s19 + $0x30] sm:$0xff] %vm713_vm0, %v1031_v28 }
 0x436   : > { %v1447_v7 = vpop.eup %1446  ;;  %1065 = vst.msk [vmem:[%s1995_s19 + $0x78] sm:$0xff] %vm713_vm0, %v1049_v53 }
 0x437   : > { %v1047_v8 = vmul.f32 %v1447_v7, %v1987_v35 }
 0x439   : > { %1064 = vst.msk [vmem:[%s1995_s19 + $0x70] sm:$0xff] %vm713_vm0, %v1047_v8 }
 0x43a PF: > { %s21_s23 = sadd.s32 1, %s1468_s23  }
 0x43b   : > { %p18_p11 = scmp.ge.s32.totalorder %s21_s23, 4  }
 0x43d   :  { %20 = sbr.rel (!%p18_p11) target bundleno = 16 (0x10), region = 75 }

</bundles_post_ra>
